<compile_context>
chip_gen: v7x
topology: tpu7x:2x2x1
jax: 0.10.0
libtpu: 0.0.40
codegen_flags: <defaults>
</compile_context>

<pallas_src>
import functools

import jax
import jax.numpy as jnp
import numpy as np
from jax.experimental import pallas as pl
from jax.experimental.pallas import tpu as pltpu

MAX_DEGREE = 10  # PyG MFConv default


# ----------------------------- fused Pallas kernel -----------------------------

def _gnn_fused_kernel(
    x_ref, emb_w_ref,                       # node embedding (bias folded into emb_w)
    adj_rel_ref, adj_all_ref, deg1h_ref,    # graph structure
    pool_ref,                               # add-pool matrix (n_graphs, N)
    rg_w_ref, rgcn_b_ref,                   # per-block RGCN fused weights
    mf_w_ref,                               # per-block MFConv fused weights
    w1_ref, b1_ref, w2_ref, b2_ref,         # post-pool MLP
    o_ref,                                  # (n_graphs, n_output)
    h_sc,                                   # VMEM (N, H) f32, persists across grid steps
    degmask_sc,                             # VMEM (N, D*H) f32, built once at blk == 0
    rg_pack_sc,                             # VMEM (N, (R+1)*H) bf16, RGCN packed operand
    mf_pack_sc,                             # VMEM (N, (2*D+1)*H) bf16, MFConv packed operand
):
    blk = pl.program_id(0)
    n_nodes, n_hidden = h_sc.shape
    n_rel = adj_rel_ref.shape[0]
    n_deg = deg1h_ref.shape[1]
    H, D = n_hidden, n_deg
    bf16 = jnp.bfloat16

    # ---- first grid step: node embedding + one-time degree-mask / bias-slab setup ----
    @pl.when(blk == 0)
    def _():
        # embedding bias folded into emb_w via the ones column appended to x
        h_sc[...] = jnp.dot(x_ref[...], emb_w_ref[...],
                            preferred_element_type=jnp.float32)
        # lane-replicated per-degree one-hot mask, built once (replaces the old
        # (N, 11*H) f32 HBM input)
        for d in range(D):
            degmask_sc[:, d * H:(d + 1) * H] = jnp.broadcast_to(
                deg1h_ref[:, d:d + 1], (n_nodes, H))
        # block-invariant one-hot slab (padded to H lanes) driving the per-degree bias
        zeros_tail = jnp.zeros((n_nodes, H - D), jnp.float32)
        mf_pack_sc[:, 2 * D * H:] = jnp.concatenate(
            [deg1h_ref[...], zeros_tail], axis=1).astype(bf16)

    # ---- ReLU -> RGCNConv (aggr='mean'), fused into ONE long-K matmul ----
    xr = jnp.maximum(h_sc[...], 0.0)                                   # (N, H) f32
    xr_b = xr.astype(bf16)
    rg_pack_sc[:, 0:H] = xr_b                                          # root term slab
    for r in range(n_rel):
        agg = jnp.dot(adj_rel_ref[r], xr_b,
                      preferred_element_type=jnp.float32)              # mean aggregation
        rg_pack_sc[:, (r + 1) * H:(r + 2) * H] = agg.astype(bf16)
    rg = (jnp.dot(rg_pack_sc[...], rg_w_ref[...],
                  preferred_element_type=jnp.float32)
          + rgcn_b_ref[...])                                           # (N, H) f32

    # ---- ReLU -> MFConv (aggr='add', degree-indexed weights), ONE long-K matmul ----
    xr2 = jnp.maximum(rg, 0.0)                                         # (N, H) f32
    xr2_b = xr2.astype(bf16)
    hn = jnp.dot(adj_all_ref[...], xr2_b,
                 preferred_element_type=jnp.float32)                   # (N, H) f32
    for d in range(D):
        m = degmask_sc[:, d * H:(d + 1) * H]                           # f32 mask slab
        mf_pack_sc[:, d * H:(d + 1) * H] = (hn * m).astype(bf16)
        mf_pack_sc[:, (D + d) * H:(D + d + 1) * H] = (xr2 * m).astype(bf16)
    h_sc[...] = jnp.dot(mf_pack_sc[...], mf_w_ref[...],
                        preferred_element_type=jnp.float32)            # W_l + W_r + bias

    # ---- last grid step: global_add_pool -> Linear -> ReLU -> Linear ----
    @pl.when(blk == pl.num_programs(0) - 1)
    def _():
        pooled = jnp.dot(pool_ref[...], h_sc[...].astype(bf16),
                         preferred_element_type=jnp.float32)
        hid = jnp.maximum(
            jnp.dot(pooled.astype(bf16), w1_ref[...],
                    preferred_element_type=jnp.float32) + b1_ref[...],
            0.0)
        o_ref[...] = (jnp.dot(hid.astype(bf16), w2_ref[...],
                              preferred_element_type=jnp.float32) + b2_ref[...])


def gnn_fused(kp, x_aug, adj_rel, adj_all, deg_onehot, pool):
    n_nodes = x_aug.shape[0]
    n_hidden = kp["emb_w_aug"].shape[1]
    n_blocks = kp["rg_w"].shape[0]
    n_rel = adj_rel.shape[0]
    n_deg = deg_onehot.shape[1]
    n_graphs = pool.shape[0]
    n_output = kp["w2"].shape[1]

    def fixed(shape):
        # grid-invariant operand: full-array block
        return pl.BlockSpec(shape, lambda b, n=len(shape): (0,) * n)

    def stacked(per_block_shape):
        # per-block operand: leading n_blocks axis squeezed, indexed by the grid step
        # (auto-pipelined: next block's weights DMA'd under the current block's compute)
        return pl.BlockSpec(
            (None,) + per_block_shape,
            lambda b, n=len(per_block_shape): (b,) + (0,) * n,
        )

    grid_spec = pltpu.PrefetchScalarGridSpec(
        num_scalar_prefetch=0,
        grid=(n_blocks,),
        in_specs=[
            fixed(x_aug.shape),
            fixed(kp["emb_w_aug"].shape),
            fixed(adj_rel.shape), fixed(adj_all.shape), fixed(deg_onehot.shape),
            fixed(pool.shape),
            stacked(kp["rg_w"].shape[1:]),
            stacked(kp["rgcn_b"].shape[1:]),
            stacked(kp["mf_w"].shape[1:]),
            fixed(kp["w1"].shape), fixed(kp["b1"].shape),
            fixed(kp["w2"].shape), fixed(kp["b2"].shape),
        ],
        out_specs=pl.BlockSpec((n_graphs, n_output), lambda b: (0, 0)),
        scratch_shapes=[
            pltpu.VMEM((n_nodes, n_hidden), jnp.float32),                      # h
            pltpu.VMEM((n_nodes, n_deg * n_hidden), jnp.float32),              # deg mask
            pltpu.VMEM((n_nodes, (n_rel + 1) * n_hidden), jnp.bfloat16),       # RGCN pack
            pltpu.VMEM((n_nodes, (2 * n_deg + 1) * n_hidden), jnp.bfloat16),   # MF pack
        ],
    )

    return pl.pallas_call(
        _gnn_fused_kernel,
        out_shape=jax.ShapeDtypeStruct((n_graphs, n_output), jnp.float32),
        grid_spec=grid_spec,
        compiler_params=pltpu.CompilerParams(
            # NOTE: must stay "arbitrary" (sequential) — h_sc carries across blocks.
            dimension_semantics=("arbitrary",),
        ),
    )(
        x_aug, kp["emb_w_aug"],
        adj_rel, adj_all, deg_onehot, pool,
        kp["rg_w"], kp["rgcn_b"], kp["mf_w"],
        kp["w1"], kp["b1"], kp["w2"], kp["b2"],
    )


# ----------------------------- host-side glue -----------------------------

def build_graph_tensors(edge_index, edge_type, batch_idx, n_nodes, n_rel, n_graphs):
    src, dst = edge_index[0], edge_index[1]
    # per-relation adjacency: adj_rel[r, i, j] = #edges j->i of relation r
    adj_rel = jnp.zeros((n_rel, n_nodes, n_nodes), jnp.float32)
    adj_rel = adj_rel.at[edge_type, dst, src].add(1.0)
    deg_rel = adj_rel.sum(axis=2, keepdims=True)
    adj_rel_mean = adj_rel / jnp.maximum(deg_rel, 1.0)      # RGCNConv aggr='mean'
    adj_all = adj_rel.sum(axis=0)                           # MFConv aggr='add'
    deg = jnp.minimum(adj_all.sum(axis=1), float(MAX_DEGREE)).astype(jnp.int32)
    deg_onehot = jax.nn.one_hot(deg, MAX_DEGREE + 1, dtype=jnp.float32)   # (N, 11)
    pool = jax.nn.one_hot(batch_idx, n_graphs, dtype=jnp.float32).T       # (B, N)
    return adj_rel_mean, adj_all, deg_onehot, pool


def pack_kernel_params(params):
    """Pack/cast the f32 master params into the kernel's bf16 fused layouts."""
    bf16 = jnp.bfloat16
    n_blocks, n_hidden, _ = params["w_root"].shape
    n_deg = MAX_DEGREE + 1
    assert n_deg <= n_hidden, "degree one-hot padded into an H-wide lane slab"
    # embedding bias folded into emb_w (paired with a ones column appended to x)
    emb_w_aug = jnp.concatenate([params["emb_w"], params["emb_b"]], axis=0).astype(bf16)
    # RGCN root + relation weights stacked along K
    rg_w = jnp.concatenate([params["w_root"], params["w_rel"]], axis=1).astype(bf16)
    # MFConv W_l / W_r / per-degree bias (padded to H rows) stacked along K
    mf_bl_pad = jnp.zeros((n_blocks, n_hidden, n_hidden), jnp.float32)
    mf_bl_pad = mf_bl_pad.at[:, :n_deg, :].set(params["mf_bl"])
    mf_w = jnp.concatenate([params["mf_wl"], params["mf_wr"], mf_bl_pad], axis=1).astype(bf16)
    return {
        "emb_w_aug": emb_w_aug,
        "rg_w": rg_w,
        "rgcn_b": params["rgcn_b"],            # f32 (VPU add)
        "mf_w": mf_w,
        "w1": params["w1"].astype(bf16), "b1": params["b1"],
        "w2": params["w2"].astype(bf16), "b2": params["b2"],
    }


def init_params(key, n_node_features, n_edge_features, n_hidden, n_output, n_blocks):
    n_deg = MAX_DEGREE + 1

    def dense(k, shape, scale=0.1):
        return scale * jax.random.normal(k, shape, jnp.float32)

    keys = jax.random.split(key, 12)
    return {
        "emb_w": dense(keys[0], (n_node_features, n_hidden)),
        "emb_b": dense(keys[1], (1, n_hidden)),
        "w_root": dense(keys[2], (n_blocks, n_hidden, n_hidden)),
        # relation weights pre-flattened to (B, R*H, H)
        "w_rel": dense(keys[3], (n_blocks, n_edge_features, n_hidden, n_hidden)).reshape(
            n_blocks, n_edge_features * n_hidden, n_hidden),
        "rgcn_b": dense(keys[4], (n_blocks, 1, n_hidden)),
        # MFConv degree-indexed weights pre-flattened to (B, 11*H, H)
        "mf_wl": dense(keys[5], (n_blocks, n_deg, n_hidden, n_hidden)).reshape(
            n_blocks, n_deg * n_hidden, n_hidden),
        "mf_wr": dense(keys[6], (n_blocks, n_deg, n_hidden, n_hidden)).reshape(
            n_blocks, n_deg * n_hidden, n_hidden),
        "mf_bl": dense(keys[7], (n_blocks, n_deg, n_hidden)),
        "w1": dense(keys[8], (n_hidden, n_hidden)),
        "b1": dense(keys[9], (1, n_hidden)),
        "w2": dense(keys[10], (n_hidden, n_output)),
        "b2": dense(keys[11], (1, n_output)),
    }


@functools.partial(jax.jit, static_argnames=("n_graphs",))
def gnn_forward(params, x, edge_index, edge_type, batch_idx, n_graphs):
    n_nodes = x.shape[0]
    n_hidden = params["emb_w"].shape[1]
    n_rel = params["w_rel"].shape[1] // n_hidden
    adj_rel_mean, adj_all, deg_onehot, pool = build_graph_tensors(
        edge_index, edge_type, batch_idx, n_nodes, n_rel, n_graphs
    )
    kp = pack_kernel_params(params)
    bf16 = jnp.bfloat16
    x_aug = jnp.concatenate([x, jnp.ones((n_nodes, 1), x.dtype)], axis=1).astype(bf16)
    return gnn_fused(kp, x_aug, adj_rel_mean.astype(bf16), adj_all.astype(bf16),
                     deg_onehot, pool.astype(bf16))


# ----------------------------- pure-JAX f32 reference -----------------------------

def gnn_reference(params, x, edge_index, edge_type, batch_idx, n_graphs):
    n_nodes = x.shape[0]
    n_hidden = params["emb_w"].shape[1]
    n_rel = params["w_rel"].shape[1] // n_hidden
    n_deg = MAX_DEGREE + 1
    adj_rel_mean, adj_all, deg_onehot, pool = build_graph_tensors(
        edge_index, edge_type, batch_idx, n_nodes, n_rel, n_graphs
    )
    h = x @ params["emb_w"] + params["emb_b"]
    n_blocks = params["w_root"].shape[0]
    for b in range(n_blocks):
        xr = jnp.maximum(h, 0.0)
        w_rel = params["w_rel"][b].reshape(n_rel, n_hidden, n_hidden)
        out = xr @ params["w_root"][b] + params["rgcn_b"][b]
        for r in range(n_rel):
            out = out + (adj_rel_mean[r] @ xr) @ w_rel[r]
        xr2 = jnp.maximum(out, 0.0)
        hn = adj_all @ xr2
        wl = params["mf_wl"][b].reshape(n_deg, n_hidden, n_hidden)
        wr = params["mf_wr"][b].reshape(n_deg, n_hidden, n_hidden)
        bl = params["mf_bl"][b]
        mf = jnp.zeros_like(hn)
        for d in range(n_deg):
            cand = hn @ wl[d] + xr2 @ wr[d] + bl[d]
            mf = mf + deg_onehot[:, d:d + 1] * cand
        h = mf
    pooled = pool @ h
    hid = jnp.maximum(pooled @ params["w1"] + params["b1"], 0.0)
    return hid @ params["w2"] + params["b2"]


# --------------------------------- main ---------------------------------

if __name__ == "__main__":
    n_node_features = 8
    n_edge_features = 4
    n_hidden = 32
    n_output = 4
    n_blocks = 2

    n_nodes = 16     # 2 graphs of 8 nodes each
    n_graphs = 2
    edges_per_graph = 24

    key = jax.random.PRNGKey(0)
    ks = iter(jax.random.split(key, 10))

    x = jax.random.normal(next(ks), (n_nodes, n_node_features), jnp.float32)

    # edges stay inside their own graph (nodes 0..7 -> graph 0, nodes 8..15 -> graph 1)
    src0 = jax.random.randint(next(ks), (edges_per_graph,), 0, 8)
    dst0 = jax.random.randint(next(ks), (edges_per_graph,), 0, 8)
    src1 = jax.random.randint(next(ks), (edges_per_graph,), 8, 16)
    dst1 = jax.random.randint(next(ks), (edges_per_graph,), 8, 16)
    edge_index = jnp.stack(
        [jnp.concatenate([src0, src1]), jnp.concatenate([dst0, dst1])]
    ).astype(jnp.int32)
    edge_type = jax.random.randint(
        next(ks), (2 * edges_per_graph,), 0, n_edge_features
    ).astype(jnp.int32)
    batch_idx = jnp.concatenate(
        [jnp.zeros(8, jnp.int32), jnp.ones(8, jnp.int32)]
    )

    params = init_params(
        next(ks), n_node_features, n_edge_features, n_hidden, n_output, n_blocks
    )

    out = gnn_forward(params, x, edge_index, edge_type, batch_idx, n_graphs)
    out = jax.block_until_ready(out)
    assert out.shape == (n_graphs, n_output)

    ref = jax.block_until_ready(
        gnn_reference(params, x, edge_index, edge_type, batch_idx, n_graphs)
    )
    # bf16 MXU operands with f32 accumulation vs. the pure-f32 reference
    np.testing.assert_allclose(np.asarray(out), np.asarray(ref), rtol=5e-2, atol=5e-2)

    print("KERNEL_OK")
</pallas_src>

<mosaic_0001>
module attributes {stable_mosaic.version = 11 : i64} {
  func.func private @main(%arg0: i32) attributes {dimension_semantics = [#tpu.dimension_semantics<core_parallel>], iteration_bounds = array<i64: 2>, tpu.core_type = #tpu.core_type<sc_scalar_subcore>, window_params = []} {
    return
  }
}

module attributes {stable_mosaic.version = 11 : i64} {
  func.func private @main(%arg0: i32) attributes {dimension_semantics = [#tpu.dimension_semantics<core_parallel>], iteration_bounds = array<i64: 2>, tpu.core_type = #tpu.core_type<sc_scalar_subcore>, window_params = []} {
    return
  }
}

module attributes {stable_mosaic.version = 11 : i64} {
  func.func @_gnn_fused_kernel(%arg0: i32, %arg1: memref<16x9xbf16, #tpu.memory_space<vmem>>, %arg2: memref<9x32xbf16, #tpu.memory_space<vmem>>, %arg3: memref<4x16x16xbf16, #tpu.memory_space<vmem>>, %arg4: memref<16x16xbf16, #tpu.memory_space<vmem>>, %arg5: memref<16x11xf32, #tpu.memory_space<vmem>>, %arg6: memref<2x16xbf16, #tpu.memory_space<vmem>>, %arg7: memref<1x160x32xbf16, #tpu.memory_space<vmem>>, %arg8: memref<1x1x32xf32, #tpu.memory_space<vmem>>, %arg9: memref<1x736x32xbf16, #tpu.memory_space<vmem>>, %arg10: memref<32x32xbf16, #tpu.memory_space<vmem>>, %arg11: memref<1x32xf32, #tpu.memory_space<vmem>>, %arg12: memref<32x4xbf16, #tpu.memory_space<vmem>>, %arg13: memref<1x4xf32, #tpu.memory_space<vmem>>, %arg14: memref<2x4xf32, #tpu.memory_space<vmem>>, %arg15: memref<16x32xf32, #tpu.memory_space<vmem>>, %arg16: memref<16x352xf32, #tpu.memory_space<vmem>>, %arg17: memref<16x160xbf16, #tpu.memory_space<vmem>>, %arg18: memref<16x736xbf16, #tpu.memory_space<vmem>>) attributes {dimension_semantics = [#tpu.dimension_semantics<arbitrary>], iteration_bounds = array<i64: 2>, scalar_prefetch = 0 : i64, scratch_operands = 4 : i64, tpu.core_type = #tpu.core_type<tc>, window_params = [{pipeline_mode = #tpu.pipeline_mode<synchronous>, transform_indices = @transform_0, window_bounds = array<i64: 16, 9>}, {pipeline_mode = #tpu.pipeline_mode<synchronous>, transform_indices = @transform_1, window_bounds = array<i64: 9, 32>}, {pipeline_mode = #tpu.pipeline_mode<synchronous>, transform_indices = @transform_2, window_bounds = array<i64: 4, 16, 16>}, {pipeline_mode = #tpu.pipeline_mode<synchronous>, transform_indices = @transform_3, window_bounds = array<i64: 16, 16>}, {pipeline_mode = #tpu.pipeline_mode<synchronous>, transform_indices = @transform_4, window_bounds = array<i64: 16, 11>}, {pipeline_mode = #tpu.pipeline_mode<synchronous>, transform_indices = @transform_5, window_bounds = array<i64: 2, 16>}, {transform_indices = @transform_6, window_bounds = array<i64: 1, 160, 32>}, {transform_indices = @transform_7, window_bounds = array<i64: 1, 1, 32>}, {transform_indices = @transform_8, window_bounds = array<i64: 1, 736, 32>}, {pipeline_mode = #tpu.pipeline_mode<synchronous>, transform_indices = @transform_9, window_bounds = array<i64: 32, 32>}, {pipeline_mode = #tpu.pipeline_mode<synchronous>, transform_indices = @transform_10, window_bounds = array<i64: 1, 32>}, {pipeline_mode = #tpu.pipeline_mode<synchronous>, transform_indices = @transform_11, window_bounds = array<i64: 32, 4>}, {pipeline_mode = #tpu.pipeline_mode<synchronous>, transform_indices = @transform_12, window_bounds = array<i64: 1, 4>}, {pipeline_mode = #tpu.pipeline_mode<synchronous>, transform_indices = @transform_13, window_bounds = array<i64: 2, 4>}]} {
    %c0_i32 = arith.constant 0 : i32
    %0 = arith.cmpi eq, %arg0, %c0_i32 : i32
    %1 = arith.extui %0 : i1 to i32
    %c0_i32_0 = arith.constant 0 : i32
    %2 = arith.cmpi ne, %1, %c0_i32_0 : i32
    scf.if %2 {
      %c0_92 = arith.constant 0 : index
      %c0_93 = arith.constant 0 : index
      %126 = vector.load %arg1[%c0_92, %c0_93] : memref<16x9xbf16, #tpu.memory_space<vmem>>, vector<16x9xbf16>
      %c0_94 = arith.constant 0 : index
      %c0_95 = arith.constant 0 : index
      %127 = vector.load %arg2[%c0_94, %c0_95] : memref<9x32xbf16, #tpu.memory_space<vmem>>, vector<9x32xbf16>
      %cst_96 = arith.constant dense<0.000000e+00> : vector<16x32xf32>
      %128 = tpu.matmul %126, %127, %cst_96 {dimension_numbers = #tpu.dot_dimension_numbers<[1], [0], [0], [1], [0, 0, 1, 1], [], []>} : vector<16x9xbf16>, vector<9x32xbf16>, vector<16x32xf32> -> vector<16x32xf32>
      %c0_97 = arith.constant 0 : index
      %c0_98 = arith.constant 0 : index
      %129 = vector.load %arg15[%c0_97, %c0_98] : memref<16x32xf32, #tpu.memory_space<vmem>>, vector<16x32xf32>
      tpu.vector_store %arg15[%c0_97, %c0_98], %128 {strides = array<i32>} : memref<16x32xf32, #tpu.memory_space<vmem>>, vector<16x32xf32>,
      %c0_99 = arith.constant 0 : index
      %c0_100 = arith.constant 0 : index
      %130 = vector.load %arg5[%c0_99, %c0_100] : memref<16x11xf32, #tpu.memory_space<vmem>>, vector<16x1xf32>
      %131 = vector.shape_cast %130 : vector<16x1xf32> to vector<16x1xf32>
      %132 = vector.broadcast %131 : vector<16x1xf32> to vector<16x32xf32>
      %c0_101 = arith.constant 0 : index
      %c0_102 = arith.constant 0 : index
      %133 = vector.load %arg16[%c0_101, %c0_102] : memref<16x352xf32, #tpu.memory_space<vmem>>, vector<16x32xf32>
      tpu.vector_store %arg16[%c0_101, %c0_102], %132 {strides = array<i32>} : memref<16x352xf32, #tpu.memory_space<vmem>>, vector<16x32xf32>,
      %c0_103 = arith.constant 0 : index
      %c1_104 = arith.constant 1 : index
      %134 = vector.load %arg5[%c0_103, %c1_104] : memref<16x11xf32, #tpu.memory_space<vmem>>, vector<16x1xf32>
      %135 = vector.shape_cast %134 : vector<16x1xf32> to vector<16x1xf32>
      %136 = vector.broadcast %135 : vector<16x1xf32> to vector<16x32xf32>
      %c0_105 = arith.constant 0 : index
      %c32_106 = arith.constant 32 : index
      %137 = vector.load %arg16[%c0_105, %c32_106] : memref<16x352xf32, #tpu.memory_space<vmem>>, vector<16x32xf32>
      tpu.vector_store %arg16[%c0_105, %c32_106], %136 {strides = array<i32>} : memref<16x352xf32, #tpu.memory_space<vmem>>, vector<16x32xf32>,
      %c0_107 = arith.constant 0 : index
      %c2_108 = arith.constant 2 : index
      %138 = vector.load %arg5[%c0_107, %c2_108] : memref<16x11xf32, #tpu.memory_space<vmem>>, vector<16x1xf32>
      %139 = vector.shape_cast %138 : vector<16x1xf32> to vector<16x1xf32>
      %140 = vector.broadcast %139 : vector<16x1xf32> to vector<16x32xf32>
      %c0_109 = arith.constant 0 : index
      %c64_110 = arith.constant 64 : index
      %141 = vector.load %arg16[%c0_109, %c64_110] : memref<16x352xf32, #tpu.memory_space<vmem>>, vector<16x32xf32>
      tpu.vector_store %arg16[%c0_109, %c64_110], %140 {strides = array<i32>} : memref<16x352xf32, #tpu.memory_space<vmem>>, vector<16x32xf32>,
      %c0_111 = arith.constant 0 : index
      %c3_112 = arith.constant 3 : index
      %142 = vector.load %arg5[%c0_111, %c3_112] : memref<16x11xf32, #tpu.memory_space<vmem>>, vector<16x1xf32>
      %143 = vector.shape_cast %142 : vector<16x1xf32> to vector<16x1xf32>
      %144 = vector.broadcast %143 : vector<16x1xf32> to vector<16x32xf32>
      %c0_113 = arith.constant 0 : index
      %c96_114 = arith.constant 96 : index
      %145 = vector.load %arg16[%c0_113, %c96_114] : memref<16x352xf32, #tpu.memory_space<vmem>>, vector<16x32xf32>
      tpu.vector_store %arg16[%c0_113, %c96_114], %144 {strides = array<i32>} : memref<16x352xf32, #tpu.memory_space<vmem>>, vector<16x32xf32>,
      %c0_115 = arith.constant 0 : index
      %c4 = arith.constant 4 : index
      %146 = vector.load %arg5[%c0_115, %c4] : memref<16x11xf32, #tpu.memory_space<vmem>>, vector<16x1xf32>
      %147 = vector.shape_cast %146 : vector<16x1xf32> to vector<16x1xf32>
      %148 = vector.broadcast %147 : vector<16x1xf32> to vector<16x32xf32>
      %c0_116 = arith.constant 0 : index
      %c128_117 = arith.constant 128 : index
      %149 = vector.load %arg16[%c0_116, %c128_117] : memref<16x352xf32, #tpu.memory_space<vmem>>, vector<16x32xf32>
      tpu.vector_store %arg16[%c0_116, %c128_117], %148 {strides = array<i32>} : memref<16x352xf32, #tpu.memory_space<vmem>>, vector<16x32xf32>,
      %c0_118 = arith.constant 0 : index
      %c5 = arith.constant 5 : index
      %150 = vector.load %arg5[%c0_118, %c5] : memref<16x11xf32, #tpu.memory_space<vmem>>, vector<16x1xf32>
      %151 = vector.shape_cast %150 : vector<16x1xf32> to vector<16x1xf32>
      %152 = vector.broadcast %151 : vector<16x1xf32> to vector<16x32xf32>
      %c0_119 = arith.constant 0 : index
      %c160_120 = arith.constant 160 : index
      %153 = vector.load %arg16[%c0_119, %c160_120] : memref<16x352xf32, #tpu.memory_space<vmem>>, vector<16x32xf32>
      tpu.vector_store %arg16[%c0_119, %c160_120], %152 {strides = array<i32>} : memref<16x352xf32, #tpu.memory_space<vmem>>, vector<16x32xf32>,
      %c0_121 = arith.constant 0 : index
      %c6 = arith.constant 6 : index
      %154 = vector.load %arg5[%c0_121, %c6] : memref<16x11xf32, #tpu.memory_space<vmem>>, vector<16x1xf32>
      %155 = vector.shape_cast %154 : vector<16x1xf32> to vector<16x1xf32>
      %156 = vector.broadcast %155 : vector<16x1xf32> to vector<16x32xf32>
      %c0_122 = arith.constant 0 : index
      %c192_123 = arith.constant 192 : index
      %157 = vector.load %arg16[%c0_122, %c192_123] : memref<16x352xf32, #tpu.memory_space<vmem>>, vector<16x32xf32>
      tpu.vector_store %arg16[%c0_122, %c192_123], %156 {strides = array<i32>} : memref<16x352xf32, #tpu.memory_space<vmem>>, vector<16x32xf32>,
      %c0_124 = arith.constant 0 : index
      %c7 = arith.constant 7 : index
      %158 = vector.load %arg5[%c0_124, %c7] : memref<16x11xf32, #tpu.memory_space<vmem>>, vector<16x1xf32>
      %159 = vector.shape_cast %158 : vector<16x1xf32> to vector<16x1xf32>
      %160 = vector.broadcast %159 : vector<16x1xf32> to vector<16x32xf32>
      %c0_125 = arith.constant 0 : index
      %c224_126 = arith.constant 224 : index
      %161 = vector.load %arg16[%c0_125, %c224_126] : memref<16x352xf32, #tpu.memory_space<vmem>>, vector<16x32xf32>
      tpu.vector_store %arg16[%c0_125, %c224_126], %160 {strides = array<i32>} : memref<16x352xf32, #tpu.memory_space<vmem>>, vector<16x32xf32>,
      %c0_127 = arith.constant 0 : index
      %c8 = arith.constant 8 : index
      %162 = vector.load %arg5[%c0_127, %c8] : memref<16x11xf32, #tpu.memory_space<vmem>>, vector<16x1xf32>
      %163 = vector.shape_cast %162 : vector<16x1xf32> to vector<16x1xf32>
      %164 = vector.broadcast %163 : vector<16x1xf32> to vector<16x32xf32>
      %c0_128 = arith.constant 0 : index
      %c256_129 = arith.constant 256 : index
      %165 = vector.load %arg16[%c0_128, %c256_129] : memref<16x352xf32, #tpu.memory_space<vmem>>, vector<16x32xf32>
      tpu.vector_store %arg16[%c0_128, %c256_129], %164 {strides = array<i32>} : memref<16x352xf32, #tpu.memory_space<vmem>>, vector<16x32xf32>,
      %c0_130 = arith.constant 0 : index
      %c9 = arith.constant 9 : index
      %166 = vector.load %arg5[%c0_130, %c9] : memref<16x11xf32, #tpu.memory_space<vmem>>, vector<16x1xf32>
      %167 = vector.shape_cast %166 : vector<16x1xf32> to vector<16x1xf32>
      %168 = vector.broadcast %167 : vector<16x1xf32> to vector<16x32xf32>
      %c0_131 = arith.constant 0 : index
      %c288_132 = arith.constant 288 : index
      %169 = vector.load %arg16[%c0_131, %c288_132] : memref<16x352xf32, #tpu.memory_space<vmem>>, vector<16x32xf32>
      tpu.vector_store %arg16[%c0_131, %c288_132], %168 {strides = array<i32>} : memref<16x352xf32, #tpu.memory_space<vmem>>, vector<16x32xf32>,
      %c0_133 = arith.constant 0 : index
      %c10 = arith.constant 10 : index
      %170 = vector.load %arg5[%c0_133, %c10] : memref<16x11xf32, #tpu.memory_space<vmem>>, vector<16x1xf32>
      %171 = vector.shape_cast %170 : vector<16x1xf32> to vector<16x1xf32>
      %172 = vector.broadcast %171 : vector<16x1xf32> to vector<16x32xf32>
      %c0_134 = arith.constant 0 : index
      %c320_135 = arith.constant 320 : index
      %173 = vector.load %arg16[%c0_134, %c320_135] : memref<16x352xf32, #tpu.memory_space<vmem>>, vector<16x32xf32>
      tpu.vector_store %arg16[%c0_134, %c320_135], %172 {strides = array<i32>} : memref<16x352xf32, #tpu.memory_space<vmem>>, vector<16x32xf32>,
      %cst_136 = arith.constant 0.000000e+00 : f32
      %174 = vector.broadcast %cst_136 : f32 to vector<16x21xf32>
      %c0_137 = arith.constant 0 : index
      %c0_138 = arith.constant 0 : index
      %175 = vector.load %arg5[%c0_137, %c0_138] : memref<16x11xf32, #tpu.memory_space<vmem>>, vector<16x11xf32>
      %176 = tpu.concatenate %175, %174 in 1 : vector<16x11xf32>, vector<16x21xf32> -> vector<16x32xf32>
      %177 = arith.truncf %176 : vector<16x32xf32> to vector<16x32xbf16>
      %c0_139 = arith.constant 0 : index
      %c704 = arith.constant 704 : index
      %178 = vector.load %arg18[%c0_139, %c704] : memref<16x736xbf16, #tpu.memory_space<vmem>>, vector<16x32xbf16>
      tpu.vector_store %arg18[%c0_139, %c704], %177 {strides = array<i32>} : memref<16x736xbf16, #tpu.memory_space<vmem>>, vector<16x32xbf16>,
    } else {
    }
    %c0 = arith.constant 0 : index
    %c0_1 = arith.constant 0 : index
    %3 = vector.load %arg15[%c0, %c0_1] : memref<16x32xf32, #tpu.memory_space<vmem>>, vector<16x32xf32>
    %cst = arith.constant 0.000000e+00 : f32
    %4 = vector.broadcast %cst : f32 to vector<16x32xf32>
    %5 = arith.maximumf %3, %4 : vector<16x32xf32>
    %6 = arith.truncf %5 : vector<16x32xf32> to vector<16x32xbf16>
    %c0_2 = arith.constant 0 : index
    %c0_3 = arith.constant 0 : index
    %7 = vector.load %arg17[%c0_2, %c0_3] : memref<16x160xbf16, #tpu.memory_space<vmem>>, vector<16x32xbf16>
    tpu.vector_store %arg17[%c0_2, %c0_3], %6 {strides = array<i32>} : memref<16x160xbf16, #tpu.memory_space<vmem>>, vector<16x32xbf16>,
    %c0_4 = arith.constant 0 : index
    %c0_5 = arith.constant 0 : index
    %c0_6 = arith.constant 0 : index
    %8 = vector.load %arg3[%c0_4, %c0_5, %c0_6] : memref<4x16x16xbf16, #tpu.memory_space<vmem>>, vector<1x16x16xbf16>
    %9 = vector.shape_cast %8 : vector<1x16x16xbf16> to vector<16x16xbf16>
    %cst_7 = arith.constant dense<0.000000e+00> : vector<16x32xf32>
    %10 = tpu.matmul %9, %6, %cst_7 {dimension_numbers = #tpu.dot_dimension_numbers<[1], [0], [0], [1], [0, 0, 1, 1], [], []>} : vector<16x16xbf16>, vector<16x32xbf16>, vector<16x32xf32> -> vector<16x32xf32>
    %11 = arith.truncf %10 : vector<16x32xf32> to vector<16x32xbf16>
    %c0_8 = arith.constant 0 : index
    %c32 = arith.constant 32 : index
    %12 = vector.load %arg17[%c0_8, %c32] : memref<16x160xbf16, #tpu.memory_space<vmem>>, vector<16x32xbf16>
    tpu.vector_store %arg17[%c0_8, %c32], %11 {strides = array<i32>} : memref<16x160xbf16, #tpu.memory_space<vmem>>, vector<16x32xbf16>,
    %c1 = arith.constant 1 : index
    %c0_9 = arith.constant 0 : index
    %c0_10 = arith.constant 0 : index
    %13 = vector.load %arg3[%c1, %c0_9, %c0_10] : memref<4x16x16xbf16, #tpu.memory_space<vmem>>, vector<1x16x16xbf16>
    %14 = vector.shape_cast %13 : vector<1x16x16xbf16> to vector<16x16xbf16>
    %cst_11 = arith.constant dense<0.000000e+00> : vector<16x32xf32>
    %15 = tpu.matmul %14, %6, %cst_11 {dimension_numbers = #tpu.dot_dimension_numbers<[1], [0], [0], [1], [0, 0, 1, 1], [], []>} : vector<16x16xbf16>, vector<16x32xbf16>, vector<16x32xf32> -> vector<16x32xf32>
    %16 = arith.truncf %15 : vector<16x32xf32> to vector<16x32xbf16>
    %c0_12 = arith.constant 0 : index
    %c64 = arith.constant 64 : index
    %17 = vector.load %arg17[%c0_12, %c64] : memref<16x160xbf16, #tpu.memory_space<vmem>>, vector<16x32xbf16>
    tpu.vector_store %arg17[%c0_12, %c64], %16 {strides = array<i32>} : memref<16x160xbf16, #tpu.memory_space<vmem>>, vector<16x32xbf16>,
    %c2 = arith.constant 2 : index
    %c0_13 = arith.constant 0 : index
    %c0_14 = arith.constant 0 : index
    %18 = vector.load %arg3[%c2, %c0_13, %c0_14] : memref<4x16x16xbf16, #tpu.memory_space<vmem>>, vector<1x16x16xbf16>
    %19 = vector.shape_cast %18 : vector<1x16x16xbf16> to vector<16x16xbf16>
    %cst_15 = arith.constant dense<0.000000e+00> : vector<16x32xf32>
    %20 = tpu.matmul %19, %6, %cst_15 {dimension_numbers = #tpu.dot_dimension_numbers<[1], [0], [0], [1], [0, 0, 1, 1], [], []>} : vector<16x16xbf16>, vector<16x32xbf16>, vector<16x32xf32> -> vector<16x32xf32>
    %21 = arith.truncf %20 : vector<16x32xf32> to vector<16x32xbf16>
    %c0_16 = arith.constant 0 : index
    %c96 = arith.constant 96 : index
    %22 = vector.load %arg17[%c0_16, %c96] : memref<16x160xbf16, #tpu.memory_space<vmem>>, vector<16x32xbf16>
    tpu.vector_store %arg17[%c0_16, %c96], %21 {strides = array<i32>} : memref<16x160xbf16, #tpu.memory_space<vmem>>, vector<16x32xbf16>,
    %c3 = arith.constant 3 : index
    %c0_17 = arith.constant 0 : index
    %c0_18 = arith.constant 0 : index
    %23 = vector.load %arg3[%c3, %c0_17, %c0_18] : memref<4x16x16xbf16, #tpu.memory_space<vmem>>, vector<1x16x16xbf16>
    %24 = vector.shape_cast %23 : vector<1x16x16xbf16> to vector<16x16xbf16>
    %cst_19 = arith.constant dense<0.000000e+00> : vector<16x32xf32>
    %25 = tpu.matmul %24, %6, %cst_19 {dimension_numbers = #tpu.dot_dimension_numbers<[1], [0], [0], [1], [0, 0, 1, 1], [], []>} : vector<16x16xbf16>, vector<16x32xbf16>, vector<16x32xf32> -> vector<16x32xf32>
    %26 = arith.truncf %25 : vector<16x32xf32> to vector<16x32xbf16>
    %c0_20 = arith.constant 0 : index
    %c128 = arith.constant 128 : index
    %27 = vector.load %arg17[%c0_20, %c128] : memref<16x160xbf16, #tpu.memory_space<vmem>>, vector<16x32xbf16>
    tpu.vector_store %arg17[%c0_20, %c128], %26 {strides = array<i32>} : memref<16x160xbf16, #tpu.memory_space<vmem>>, vector<16x32xbf16>,
    %c0_21 = arith.constant 0 : index
    %c0_22 = arith.constant 0 : index
    %28 = vector.load %arg17[%c0_21, %c0_22] : memref<16x160xbf16, #tpu.memory_space<vmem>>, vector<16x160xbf16>
    %c0_23 = arith.constant 0 : index
    %c0_24 = arith.constant 0 : index
    %c0_25 = arith.constant 0 : index
    %29 = vector.load %arg7[%c0_23, %c0_24, %c0_25] : memref<1x160x32xbf16, #tpu.memory_space<vmem>>, vector<1x160x32xbf16>
    %30 = vector.shape_cast %29 : vector<1x160x32xbf16> to vector<160x32xbf16>
    %cst_26 = arith.constant dense<0.000000e+00> : vector<16x32xf32>
    %31 = tpu.matmul %28, %30, %cst_26 {dimension_numbers = #tpu.dot_dimension_numbers<[1], [0], [0], [1], [0, 0, 1, 1], [], []>} : vector<16x160xbf16>, vector<160x32xbf16>, vector<16x32xf32> -> vector<16x32xf32>
    %c0_27 = arith.constant 0 : index
    %c0_28 = arith.constant 0 : index
    %c0_29 = arith.constant 0 : index
    %32 = vector.load %arg8[%c0_27, %c0_28, %c0_29] : memref<1x1x32xf32, #tpu.memory_space<vmem>>, vector<1x1x32xf32>
    %33 = vector.shape_cast %32 : vector<1x1x32xf32> to vector<1x32xf32>
    %34 = vector.broadcast %33 : vector<1x32xf32> to vector<16x32xf32>
    %35 = arith.addf %31, %34 : vector<16x32xf32>
    %cst_30 = arith.constant 0.000000e+00 : f32
    %36 = vector.broadcast %cst_30 : f32 to vector<16x32xf32>
    %37 = arith.maximumf %35, %36 : vector<16x32xf32>
    %38 = arith.truncf %37 : vector<16x32xf32> to vector<16x32xbf16>
    %c0_31 = arith.constant 0 : index
    %c0_32 = arith.constant 0 : index
    %39 = vector.load %arg4[%c0_31, %c0_32] : memref<16x16xbf16, #tpu.memory_space<vmem>>, vector<16x16xbf16>
    %cst_33 = arith.constant dense<0.000000e+00> : vector<16x32xf32>
    %40 = tpu.matmul %39, %38, %cst_33 {dimension_numbers = #tpu.dot_dimension_numbers<[1], [0], [0], [1], [0, 0, 1, 1], [], []>} : vector<16x16xbf16>, vector<16x32xbf16>, vector<16x32xf32> -> vector<16x32xf32>
    %c0_34 = arith.constant 0 : index
    %c0_35 = arith.constant 0 : index
    %41 = vector.load %arg16[%c0_34, %c0_35] : memref<16x352xf32, #tpu.memory_space<vmem>>, vector<16x32xf32>
    %42 = arith.mulf %40, %41 : vector<16x32xf32>
    %43 = arith.truncf %42 : vector<16x32xf32> to vector<16x32xbf16>
    %c0_36 = arith.constant 0 : index
    %c0_37 = arith.constant 0 : index
    %44 = vector.load %arg18[%c0_36, %c0_37] : memref<16x736xbf16, #tpu.memory_space<vmem>>, vector<16x32xbf16>
    tpu.vector_store %arg18[%c0_36, %c0_37], %43 {strides = array<i32>} : memref<16x736xbf16, #tpu.memory_space<vmem>>, vector<16x32xbf16>,
    %45 = arith.mulf %37, %41 : vector<16x32xf32>
    %46 = arith.truncf %45 : vector<16x32xf32> to vector<16x32xbf16>
    %c0_38 = arith.constant 0 : index
    %c352 = arith.constant 352 : index
    %47 = vector.load %arg18[%c0_38, %c352] : memref<16x736xbf16, #tpu.memory_space<vmem>>, vector<16x32xbf16>
    tpu.vector_store %arg18[%c0_38, %c352], %46 {strides = array<i32>} : memref<16x736xbf16, #tpu.memory_space<vmem>>, vector<16x32xbf16>,
    %c0_39 = arith.constant 0 : index
    %c32_40 = arith.constant 32 : index
    %48 = vector.load %arg16[%c0_39, %c32_40] : memref<16x352xf32, #tpu.memory_space<vmem>>, vector<16x32xf32>
    %49 = arith.mulf %40, %48 : vector<16x32xf32>
    %50 = arith.truncf %49 : vector<16x32xf32> to vector<16x32xbf16>
    %c0_41 = arith.constant 0 : index
    %c32_42 = arith.constant 32 : index
    %51 = vector.load %arg18[%c0_41, %c32_42] : memref<16x736xbf16, #tpu.memory_space<vmem>>, vector<16x32xbf16>
    tpu.vector_store %arg18[%c0_41, %c32_42], %50 {strides = array<i32>} : memref<16x736xbf16, #tpu.memory_space<vmem>>, vector<16x32xbf16>,
    %52 = arith.mulf %37, %48 : vector<16x32xf32>
    %53 = arith.truncf %52 : vector<16x32xf32> to vector<16x32xbf16>
    %c0_43 = arith.constant 0 : index
    %c384 = arith.constant 384 : index
    %54 = vector.load %arg18[%c0_43, %c384] : memref<16x736xbf16, #tpu.memory_space<vmem>>, vector<16x32xbf16>
    tpu.vector_store %arg18[%c0_43, %c384], %53 {strides = array<i32>} : memref<16x736xbf16, #tpu.memory_space<vmem>>, vector<16x32xbf16>,
    %c0_44 = arith.constant 0 : index
    %c64_45 = arith.constant 64 : index
    %55 = vector.load %arg16[%c0_44, %c64_45] : memref<16x352xf32, #tpu.memory_space<vmem>>, vector<16x32xf32>
    %56 = arith.mulf %40, %55 : vector<16x32xf32>
    %57 = arith.truncf %56 : vector<16x32xf32> to vector<16x32xbf16>
    %c0_46 = arith.constant 0 : index
    %c64_47 = arith.constant 64 : index
    %58 = vector.load %arg18[%c0_46, %c64_47] : memref<16x736xbf16, #tpu.memory_space<vmem>>, vector<16x32xbf16>
    tpu.vector_store %arg18[%c0_46, %c64_47], %57 {strides = array<i32>} : memref<16x736xbf16, #tpu.memory_space<vmem>>, vector<16x32xbf16>,
    %59 = arith.mulf %37, %55 : vector<16x32xf32>
    %60 = arith.truncf %59 : vector<16x32xf32> to vector<16x32xbf16>
    %c0_48 = arith.constant 0 : index
    %c416 = arith.constant 416 : index
    %61 = vector.load %arg18[%c0_48, %c416] : memref<16x736xbf16, #tpu.memory_space<vmem>>, vector<16x32xbf16>
    tpu.vector_store %arg18[%c0_48, %c416], %60 {strides = array<i32>} : memref<16x736xbf16, #tpu.memory_space<vmem>>, vector<16x32xbf16>,
    %c0_49 = arith.constant 0 : index
    %c96_50 = arith.constant 96 : index
    %62 = vector.load %arg16[%c0_49, %c96_50] : memref<16x352xf32, #tpu.memory_space<vmem>>, vector<16x32xf32>
    %63 = arith.mulf %40, %62 : vector<16x32xf32>
    %64 = arith.truncf %63 : vector<16x32xf32> to vector<16x32xbf16>
    %c0_51 = arith.constant 0 : index
    %c96_52 = arith.constant 96 : index
    %65 = vector.load %arg18[%c0_51, %c96_52] : memref<16x736xbf16, #tpu.memory_space<vmem>>, vector<16x32xbf16>
    tpu.vector_store %arg18[%c0_51, %c96_52], %64 {strides = array<i32>} : memref<16x736xbf16, #tpu.memory_space<vmem>>, vector<16x32xbf16>,
    %66 = arith.mulf %37, %62 : vector<16x32xf32>
    %67 = arith.truncf %66 : vector<16x32xf32> to vector<16x32xbf16>
    %c0_53 = arith.constant 0 : index
    %c448 = arith.constant 448 : index
    %68 = vector.load %arg18[%c0_53, %c448] : memref<16x736xbf16, #tpu.memory_space<vmem>>, vector<16x32xbf16>
    tpu.vector_store %arg18[%c0_53, %c448], %67 {strides = array<i32>} : memref<16x736xbf16, #tpu.memory_space<vmem>>, vector<16x32xbf16>,
    %c0_54 = arith.constant 0 : index
    %c128_55 = arith.constant 128 : index
    %69 = vector.load %arg16[%c0_54, %c128_55] : memref<16x352xf32, #tpu.memory_space<vmem>>, vector<16x32xf32>
    %70 = arith.mulf %40, %69 : vector<16x32xf32>
    %71 = arith.truncf %70 : vector<16x32xf32> to vector<16x32xbf16>
    %c0_56 = arith.constant 0 : index
    %c128_57 = arith.constant 128 : index
    %72 = vector.load %arg18[%c0_56, %c128_57] : memref<16x736xbf16, #tpu.memory_space<vmem>>, vector<16x32xbf16>
    tpu.vector_store %arg18[%c0_56, %c128_57], %71 {strides = array<i32>} : memref<16x736xbf16, #tpu.memory_space<vmem>>, vector<16x32xbf16>,
    %73 = arith.mulf %37, %69 : vector<16x32xf32>
    %74 = arith.truncf %73 : vector<16x32xf32> to vector<16x32xbf16>
    %c0_58 = arith.constant 0 : index
    %c480 = arith.constant 480 : index
    %75 = vector.load %arg18[%c0_58, %c480] : memref<16x736xbf16, #tpu.memory_space<vmem>>, vector<16x32xbf16>
    tpu.vector_store %arg18[%c0_58, %c480], %74 {strides = array<i32>} : memref<16x736xbf16, #tpu.memory_space<vmem>>, vector<16x32xbf16>,
    %c0_59 = arith.constant 0 : index
    %c160 = arith.constant 160 : index
    %76 = vector.load %arg16[%c0_59, %c160] : memref<16x352xf32, #tpu.memory_space<vmem>>, vector<16x32xf32>
    %77 = arith.mulf %40, %76 : vector<16x32xf32>
    %78 = arith.truncf %77 : vector<16x32xf32> to vector<16x32xbf16>
    %c0_60 = arith.constant 0 : index
    %c160_61 = arith.constant 160 : index
    %79 = vector.load %arg18[%c0_60, %c160_61] : memref<16x736xbf16, #tpu.memory_space<vmem>>, vector<16x32xbf16>
    tpu.vector_store %arg18[%c0_60, %c160_61], %78 {strides = array<i32>} : memref<16x736xbf16, #tpu.memory_space<vmem>>, vector<16x32xbf16>,
    %80 = arith.mulf %37, %76 : vector<16x32xf32>
    %81 = arith.truncf %80 : vector<16x32xf32> to vector<16x32xbf16>
    %c0_62 = arith.constant 0 : index
    %c512 = arith.constant 512 : index
    %82 = vector.load %arg18[%c0_62, %c512] : memref<16x736xbf16, #tpu.memory_space<vmem>>, vector<16x32xbf16>
    tpu.vector_store %arg18[%c0_62, %c512], %81 {strides = array<i32>} : memref<16x736xbf16, #tpu.memory_space<vmem>>, vector<16x32xbf16>,
    %c0_63 = arith.constant 0 : index
    %c192 = arith.constant 192 : index
    %83 = vector.load %arg16[%c0_63, %c192] : memref<16x352xf32, #tpu.memory_space<vmem>>, vector<16x32xf32>
    %84 = arith.mulf %40, %83 : vector<16x32xf32>
    %85 = arith.truncf %84 : vector<16x32xf32> to vector<16x32xbf16>
    %c0_64 = arith.constant 0 : index
    %c192_65 = arith.constant 192 : index
    %86 = vector.load %arg18[%c0_64, %c192_65] : memref<16x736xbf16, #tpu.memory_space<vmem>>, vector<16x32xbf16>
    tpu.vector_store %arg18[%c0_64, %c192_65], %85 {strides = array<i32>} : memref<16x736xbf16, #tpu.memory_space<vmem>>, vector<16x32xbf16>,
    %87 = arith.mulf %37, %83 : vector<16x32xf32>
    %88 = arith.truncf %87 : vector<16x32xf32> to vector<16x32xbf16>
    %c0_66 = arith.constant 0 : index
    %c544 = arith.constant 544 : index
    %89 = vector.load %arg18[%c0_66, %c544] : memref<16x736xbf16, #tpu.memory_space<vmem>>, vector<16x32xbf16>
    tpu.vector_store %arg18[%c0_66, %c544], %88 {strides = array<i32>} : memref<16x736xbf16, #tpu.memory_space<vmem>>, vector<16x32xbf16>,
    %c0_67 = arith.constant 0 : index
    %c224 = arith.constant 224 : index
    %90 = vector.load %arg16[%c0_67, %c224] : memref<16x352xf32, #tpu.memory_space<vmem>>, vector<16x32xf32>
    %91 = arith.mulf %40, %90 : vector<16x32xf32>
    %92 = arith.truncf %91 : vector<16x32xf32> to vector<16x32xbf16>
    %c0_68 = arith.constant 0 : index
    %c224_69 = arith.constant 224 : index
    %93 = vector.load %arg18[%c0_68, %c224_69] : memref<16x736xbf16, #tpu.memory_space<vmem>>, vector<16x32xbf16>
    tpu.vector_store %arg18[%c0_68, %c224_69], %92 {strides = array<i32>} : memref<16x736xbf16, #tpu.memory_space<vmem>>, vector<16x32xbf16>,
    %94 = arith.mulf %37, %90 : vector<16x32xf32>
    %95 = arith.truncf %94 : vector<16x32xf32> to vector<16x32xbf16>
    %c0_70 = arith.constant 0 : index
    %c576 = arith.constant 576 : index
    %96 = vector.load %arg18[%c0_70, %c576] : memref<16x736xbf16, #tpu.memory_space<vmem>>, vector<16x32xbf16>
    tpu.vector_store %arg18[%c0_70, %c576], %95 {strides = array<i32>} : memref<16x736xbf16, #tpu.memory_space<vmem>>, vector<16x32xbf16>,
    %c0_71 = arith.constant 0 : index
    %c256 = arith.constant 256 : index
    %97 = vector.load %arg16[%c0_71, %c256] : memref<16x352xf32, #tpu.memory_space<vmem>>, vector<16x32xf32>
    %98 = arith.mulf %40, %97 : vector<16x32xf32>
    %99 = arith.truncf %98 : vector<16x32xf32> to vector<16x32xbf16>
    %c0_72 = arith.constant 0 : index
    %c256_73 = arith.constant 256 : index
    %100 = vector.load %arg18[%c0_72, %c256_73] : memref<16x736xbf16, #tpu.memory_space<vmem>>, vector<16x32xbf16>
    tpu.vector_store %arg18[%c0_72, %c256_73], %99 {strides = array<i32>} : memref<16x736xbf16, #tpu.memory_space<vmem>>, vector<16x32xbf16>,
    %101 = arith.mulf %37, %97 : vector<16x32xf32>
    %102 = arith.truncf %101 : vector<16x32xf32> to vector<16x32xbf16>
    %c0_74 = arith.constant 0 : index
    %c608 = arith.constant 608 : index
    %103 = vector.load %arg18[%c0_74, %c608] : memref<16x736xbf16, #tpu.memory_space<vmem>>, vector<16x32xbf16>
    tpu.vector_store %arg18[%c0_74, %c608], %102 {strides = array<i32>} : memref<16x736xbf16, #tpu.memory_space<vmem>>, vector<16x32xbf16>,
    %c0_75 = arith.constant 0 : index
    %c288 = arith.constant 288 : index
    %104 = vector.load %arg16[%c0_75, %c288] : memref<16x352xf32, #tpu.memory_space<vmem>>, vector<16x32xf32>
    %105 = arith.mulf %40, %104 : vector<16x32xf32>
    %106 = arith.truncf %105 : vector<16x32xf32> to vector<16x32xbf16>
    %c0_76 = arith.constant 0 : index
    %c288_77 = arith.constant 288 : index
    %107 = vector.load %arg18[%c0_76, %c288_77] : memref<16x736xbf16, #tpu.memory_space<vmem>>, vector<16x32xbf16>
    tpu.vector_store %arg18[%c0_76, %c288_77], %106 {strides = array<i32>} : memref<16x736xbf16, #tpu.memory_space<vmem>>, vector<16x32xbf16>,
    %108 = arith.mulf %37, %104 : vector<16x32xf32>
    %109 = arith.truncf %108 : vector<16x32xf32> to vector<16x32xbf16>
    %c0_78 = arith.constant 0 : index
    %c640 = arith.constant 640 : index
    %110 = vector.load %arg18[%c0_78, %c640] : memref<16x736xbf16, #tpu.memory_space<vmem>>, vector<16x32xbf16>
    tpu.vector_store %arg18[%c0_78, %c640], %109 {strides = array<i32>} : memref<16x736xbf16, #tpu.memory_space<vmem>>, vector<16x32xbf16>,
    %c0_79 = arith.constant 0 : index
    %c320 = arith.constant 320 : index
    %111 = vector.load %arg16[%c0_79, %c320] : memref<16x352xf32, #tpu.memory_space<vmem>>, vector<16x32xf32>
    %112 = arith.mulf %40, %111 : vector<16x32xf32>
    %113 = arith.truncf %112 : vector<16x32xf32> to vector<16x32xbf16>
    %c0_80 = arith.constant 0 : index
    %c320_81 = arith.constant 320 : index
    %114 = vector.load %arg18[%c0_80, %c320_81] : memref<16x736xbf16, #tpu.memory_space<vmem>>, vector<16x32xbf16>
    tpu.vector_store %arg18[%c0_80, %c320_81], %113 {strides = array<i32>} : memref<16x736xbf16, #tpu.memory_space<vmem>>, vector<16x32xbf16>,
    %115 = arith.mulf %37, %111 : vector<16x32xf32>
    %116 = arith.truncf %115 : vector<16x32xf32> to vector<16x32xbf16>
    %c0_82 = arith.constant 0 : index
    %c672 = arith.constant 672 : index
    %117 = vector.load %arg18[%c0_82, %c672] : memref<16x736xbf16, #tpu.memory_space<vmem>>, vector<16x32xbf16>
    tpu.vector_store %arg18[%c0_82, %c672], %116 {strides = array<i32>} : memref<16x736xbf16, #tpu.memory_space<vmem>>, vector<16x32xbf16>,
    %c0_83 = arith.constant 0 : index
    %c0_84 = arith.constant 0 : index
    %118 = vector.load %arg18[%c0_83, %c0_84] : memref<16x736xbf16, #tpu.memory_space<vmem>>, vector<16x736xbf16>
    %c0_85 = arith.constant 0 : index
    %c0_86 = arith.constant 0 : index
    %c0_87 = arith.constant 0 : index
    %119 = vector.load %arg9[%c0_85, %c0_86, %c0_87] : memref<1x736x32xbf16, #tpu.memory_space<vmem>>, vector<1x736x32xbf16>
    %120 = vector.shape_cast %119 : vector<1x736x32xbf16> to vector<736x32xbf16>
    %cst_88 = arith.constant dense<0.000000e+00> : vector<16x32xf32>
    %121 = tpu.matmul %118, %120, %cst_88 {dimension_numbers = #tpu.dot_dimension_numbers<[1], [0], [0], [1], [0, 0, 1, 1], [], []>} : vector<16x736xbf16>, vector<736x32xbf16>, vector<16x32xf32> -> vector<16x32xf32>
    %c0_89 = arith.constant 0 : index
    %c0_90 = arith.constant 0 : index
    %122 = vector.load %arg15[%c0_89, %c0_90] : memref<16x32xf32, #tpu.memory_space<vmem>>, vector<16x32xf32>
    tpu.vector_store %arg15[%c0_89, %c0_90], %121 {strides = array<i32>} : memref<16x32xf32, #tpu.memory_space<vmem>>, vector<16x32xf32>,
    %c1_i32 = arith.constant 1 : i32
    %123 = arith.cmpi eq, %arg0, %c1_i32 : i32
    %124 = arith.extui %123 : i1 to i32
    %c0_i32_91 = arith.constant 0 : i32
    %125 = arith.cmpi ne, %124, %c0_i32_91 : i32
    scf.if %125 {
      %c0_92 = arith.constant 0 : index
      %c0_93 = arith.constant 0 : index
      %126 = vector.load %arg6[%c0_92, %c0_93] : memref<2x16xbf16, #tpu.memory_space<vmem>>, vector<2x16xbf16>
      %c0_94 = arith.constant 0 : index
      %c0_95 = arith.constant 0 : index
      %127 = vector.load %arg15[%c0_94, %c0_95] : memref<16x32xf32, #tpu.memory_space<vmem>>, vector<16x32xf32>
      %128 = arith.truncf %127 : vector<16x32xf32> to vector<16x32xbf16>
      %cst_96 = arith.constant dense<0.000000e+00> : vector<2x32xf32>
      %129 = tpu.matmul %126, %128, %cst_96 {dimension_numbers = #tpu.dot_dimension_numbers<[1], [0], [0], [1], [0, 0, 1, 1], [], []>} : vector<2x16xbf16>, vector<16x32xbf16>, vector<2x32xf32> -> vector<2x32xf32>
      %130 = arith.truncf %129 : vector<2x32xf32> to vector<2x32xbf16>
      %c0_97 = arith.constant 0 : index
      %c0_98 = arith.constant 0 : index
      %131 = vector.load %arg10[%c0_97, %c0_98] : memref<32x32xbf16, #tpu.memory_space<vmem>>, vector<32x32xbf16>
      %cst_99 = arith.constant dense<0.000000e+00> : vector<2x32xf32>
      %132 = tpu.matmul %130, %131, %cst_99 {dimension_numbers = #tpu.dot_dimension_numbers<[1], [0], [0], [1], [0, 0, 1, 1], [], []>} : vector<2x32xbf16>, vector<32x32xbf16>, vector<2x32xf32> -> vector<2x32xf32>
      %c0_100 = arith.constant 0 : index
      %c0_101 = arith.constant 0 : index
      %133 = vector.load %arg11[%c0_100, %c0_101] : memref<1x32xf32, #tpu.memory_space<vmem>>, vector<1x32xf32>
      %134 = vector.broadcast %133 : vector<1x32xf32> to vector<2x32xf32>
      %135 = arith.addf %132, %134 : vector<2x32xf32>
      %cst_102 = arith.constant 0.000000e+00 : f32
      %136 = vector.broadcast %cst_102 : f32 to vector<2x32xf32>
      %137 = arith.maximumf %135, %136 : vector<2x32xf32>
      %138 = arith.truncf %137 : vector<2x32xf32> to vector<2x32xbf16>
      %c0_103 = arith.constant 0 : index
      %c0_104 = arith.constant 0 : index
      %139 = vector.load %arg12[%c0_103, %c0_104] : memref<32x4xbf16, #tpu.memory_space<vmem>>, vector<32x4xbf16>
      %cst_105 = arith.constant dense<0.000000e+00> : vector<2x4xf32>
      %140 = tpu.matmul %138, %139, %cst_105 {dimension_numbers = #tpu.dot_dimension_numbers<[1], [0], [0], [1], [0, 0, 1, 1], [], []>} : vector<2x32xbf16>, vector<32x4xbf16>, vector<2x4xf32> -> vector<2x4xf32>
      %c0_106 = arith.constant 0 : index
      %c0_107 = arith.constant 0 : index
      %141 = vector.load %arg13[%c0_106, %c0_107] : memref<1x4xf32, #tpu.memory_space<vmem>>, vector<1x4xf32>
      %142 = vector.broadcast %141 : vector<1x4xf32> to vector<2x4xf32>
      %143 = arith.addf %140, %142 : vector<2x4xf32>
      %c0_108 = arith.constant 0 : index
      %c0_109 = arith.constant 0 : index
      %144 = vector.load %arg14[%c0_108, %c0_109] : memref<2x4xf32, #tpu.memory_space<vmem>>, vector<2x4xf32>
      tpu.vector_store %arg14[%c0_108, %c0_109], %143 {strides = array<i32>} : memref<2x4xf32, #tpu.memory_space<vmem>>, vector<2x4xf32>,
    } else {
    }
    return
  }
  func.func @transform_0(%arg0: i32) -> (i32, i32) {
    %c0_i32 = arith.constant 0 : i32
    %c0_i32_0 = arith.constant 0 : i32
    %c0_i32_1 = arith.constant 0 : i32
    return %c0_i32, %c0_i32_0 : i32, i32
  }
  func.func @transform_1(%arg0: i32) -> (i32, i32) {
    %c0_i32 = arith.constant 0 : i32
    %c0_i32_0 = arith.constant 0 : i32
    %c0_i32_1 = arith.constant 0 : i32
    return %c0_i32, %c0_i32_0 : i32, i32
  }
  func.func @transform_2(%arg0: i32) -> (i32, i32, i32) {
    %c0_i32 = arith.constant 0 : i32
    %c0_i32_0 = arith.constant 0 : i32
    %c0_i32_1 = arith.constant 0 : i32
    %c0_i32_2 = arith.constant 0 : i32
    return %c0_i32, %c0_i32_0, %c0_i32_1 : i32, i32, i32
  }
  func.func @transform_3(%arg0: i32) -> (i32, i32) {
    %c0_i32 = arith.constant 0 : i32
    %c0_i32_0 = arith.constant 0 : i32
    %c0_i32_1 = arith.constant 0 : i32
    return %c0_i32, %c0_i32_0 : i32, i32
  }
  func.func @transform_4(%arg0: i32) -> (i32, i32) {
    %c0_i32 = arith.constant 0 : i32
    %c0_i32_0 = arith.constant 0 : i32
    %c0_i32_1 = arith.constant 0 : i32
    return %c0_i32, %c0_i32_0 : i32, i32
  }
  func.func @transform_5(%arg0: i32) -> (i32, i32) {
    %c0_i32 = arith.constant 0 : i32
    %c0_i32_0 = arith.constant 0 : i32
    %c0_i32_1 = arith.constant 0 : i32
    return %c0_i32, %c0_i32_0 : i32, i32
  }
  func.func @transform_6(%arg0: i32) -> (i32, i32, i32) {
    %c0_i32 = arith.constant 0 : i32
    %c0_i32_0 = arith.constant 0 : i32
    %c0_i32_1 = arith.constant 0 : i32
    return %arg0, %c0_i32, %c0_i32_0 : i32, i32, i32
  }
  func.func @transform_7(%arg0: i32) -> (i32, i32, i32) {
    %c0_i32 = arith.constant 0 : i32
    %c0_i32_0 = arith.constant 0 : i32
    %c0_i32_1 = arith.constant 0 : i32
    return %arg0, %c0_i32, %c0_i32_0 : i32, i32, i32
  }
  func.func @transform_8(%arg0: i32) -> (i32, i32, i32) {
    %c0_i32 = arith.constant 0 : i32
    %c0_i32_0 = arith.constant 0 : i32
    %c0_i32_1 = arith.constant 0 : i32
    return %arg0, %c0_i32, %c0_i32_0 : i32, i32, i32
  }
  func.func @transform_9(%arg0: i32) -> (i32, i32) {
    %c0_i32 = arith.constant 0 : i32
    %c0_i32_0 = arith.constant 0 : i32
    %c0_i32_1 = arith.constant 0 : i32
    return %c0_i32, %c0_i32_0 : i32, i32
  }
  func.func @transform_10(%arg0: i32) -> (i32, i32) {
    %c0_i32 = arith.constant 0 : i32
    %c0_i32_0 = arith.constant 0 : i32
    %c0_i32_1 = arith.constant 0 : i32
    return %c0_i32, %c0_i32_0 : i32, i32
  }
  func.func @transform_11(%arg0: i32) -> (i32, i32) {
    %c0_i32 = arith.constant 0 : i32
    %c0_i32_0 = arith.constant 0 : i32
    %c0_i32_1 = arith.constant 0 : i32
    return %c0_i32, %c0_i32_0 : i32, i32
  }
  func.func @transform_12(%arg0: i32) -> (i32, i32) {
    %c0_i32 = arith.constant 0 : i32
    %c0_i32_0 = arith.constant 0 : i32
    %c0_i32_1 = arith.constant 0 : i32
    return %c0_i32, %c0_i32_0 : i32, i32
  }
  func.func @transform_13(%arg0: i32) -> (i32, i32) {
    %c0_i32 = arith.constant 0 : i32
    %c0_i32_0 = arith.constant 0 : i32
    %c0_i32_1 = arith.constant 0 : i32
    return %c0_i32, %c0_i32_0 : i32, i32
  }
}

</mosaic_0001>

<bundles_post_ra>
// kernel: gnn_forward.1
= control target key start
LH: loop header
LB: loop body
LE: loop exit
PB: predicated region body
PF: predicated region fallthrough
CT: control target
= control target key end

     0   :  { %18 = vsyncpa [#allocation7], 0  ;;  %s2602_s25 = smov 0   ;;  %s3084_s0 = inlined_call_operand.vmem [shape: bf16[16,9], index: 0, kind: input, shape index: {}]   ;;  %s3085_s1 = inlined_call_operand.vmem [shape: bf16[9,32], index: 1, kind: input, shape index: {}]   ;;  %s3086_s2 = inlined_call_operand.vmem [shape: bf16[4,16,16], index: 2, kind: input, shape index: {}]   ;;  %s3087_s3 = inlined_call_operand.vmem [shape: bf16[16,16], index: 3, kind: input, shape index: {}]   ;;  %s3088_s4 = inlined_call_operand.vmem [shape: f32[16,11], index: 4, kind: input, shape index: {}]   ;;  %s3089_s5 = inlined_call_operand.vmem [shape: bf16[2,16], index: 5, kind: input, shape index: {}]   ;;  %s3090_s6 = inlined_call_operand.vmem [shape: bf16[2,160,32], index: 6, kind: input, shape index: {}]   ;;  %s3091_s7 = inlined_call_operand.vmem [shape: f32[2,1,32], index: 7, kind: input, shape index: {}]   ;;  %s3092_s8 = inlined_call_operand.vmem [shape: bf16[2,736,32], index: 8, kind: input, shape index: {}]   ;;  %s3093_s9 = inlined_call_operand.vmem [shape: bf16[32,32], index: 9, kind: input, shape index: {}]   ;;  %s3094_s10 = inlined_call_operand.vmem [shape: f32[1,32], index: 10, kind: input, shape index: {}]   ;;  %s3095_s11 = inlined_call_operand.vmem [shape: bf16[32,4], index: 11, kind: input, shape index: {}]   ;;  %s3096_s12 = inlined_call_operand.vmem [shape: f32[1,4], index: 12, kind: input, shape index: {}]   ;;  %s3097_s13 = inlined_call_operand.hbm [shape: f32[2,4], index: 13, kind: output, shape index: {}]  }
   0x1 LB: > { %s2608_s26 = sadd.s32 4294967295, %s2506_s25   ;;  %p2127_p0 = scmp.ge.s32.totalorder %s2506_s25, 1  ;;  %s2506_s25 = sphi %s2602_s25, %s24_s25  }
   0x2   : > { %p401_p1 = scmp.lt.s32.totalorder %s2506_s25, 3 }
   0x4   : > { %p402_p2 = pnand %p2127_p0, %p401_p1 }
   0x5   : > { %p448_p3 = scmp.lt.s32.totalorder (!%p402_p2), %s2608_s26, 1  ;;  %p2130_p4 = scmp.ne.s32.totalorder (!%p402_p2), %s2608_s26, 0 }
   0x6   : > { %405 = sbr.rel (%p402_p2) target bundleno = 2137 (0x859), region = 72 }
   0xd   : > { %s2614_s27 = scalar_select %p448_p3, %s2608_s26, 1 }
   0xe   : > { %465 = sbr.rel (%p2130_p4) target bundleno = 238 (0xee), region = 76  ;;  %vm484_vm0 = vcmask (!%p2130_p4), 1043456   ;;  %v2508_v0 = vmov (!%p2130_p4), 0.0   ;;  %v2403_v1 = vld [vmem:[%s3085_s1] sm:$0x1f] (!%p2130_p4)   ;;  %vm485_vm1 = vcmask (!%p2130_p4), 1044480  }
   0xf   : > { %s2345_s28 = smul.u32 80, %s2614_s27  ;;  %s455_s14 = scalar_lea.vmem %s3091_s7, %s2614_s27  ;;  %2287 = vmatprep.subr.bf16.mxu0 (!%p2130_p4), %v2508_v0  ;;  %v2509_v2 = vmov (!%p2130_p4), 65535   ;;  %vm2510_vm2 = vmmov (!%p2130_p4), 0   ;;  %v535_v5 = vld [vmem:[%s3088_s4] sm:$0xff] (!%p2130_p4)  ;;  %v2511_v7 = vmov (!%p2130_p4), 0   ;;  %v2512_v8 = vmov (!%p2130_p4), 1  }
  0x10   : > { %s2346_s15 = smul.u32 368, %s2614_s27  ;;  %v486_v3 = vsel (!%p2130_p4), %vm484_vm0, 4294967295, %v2509_v2  ;;  %2289 = vmatprep.mubr.msk.bf16.mxu0 (!%p2130_p4), %vm2510_vm2, %v2508_v0  ;;  %2385 = vset.pattern.permute.xlu0 (!%p2130_p4), %v2511_v7  ;;  %v2404_v9 = vld [vmem:[%s3084_s0] sm:$0xff] (!%p2130_p4)   ;;  %vm480_vm3 = vcmask (!%p2130_p4), 72704   ;;  %v536_v10 = vld [vmem:[%s3088_s4 + $0x8] sm:$0xff] (!%p2130_p4)  ;;  %v2513_v11 = vmov (!%p2130_p4), 2  }
  0x11   : > { %s2625_s18 = scalar_lea.vmem %s3090_s6, %s2345_s28  ;;  %v487_v4 = vsel (!%p2130_p4), %vm485_vm1, %v486_v3, 0  ;;  %2386 = vset.pattern.permute.xlu1 (!%p2130_p4), %v2512_v8  ;;  %539 = vperm.xlu0 (!%p2130_p4), %2385, %v535_v5   ;;  %v2514_v12 = vmov (!%p2130_p4), 4   ;;  %v2515_v13 = vmov (!%p2130_p4), 8   ;;  %v2516_v14 = vmov (!%p2130_p4), 5   ;;  %s2521_s17 = smov (!%p2130_p4), 64  }
  0x12   : > { %s2630_s21 = scalar_lea.vmem %s3092_s8, %s2346_s15  ;;  %v489_v6 = vand.u32 (!%p2130_p4), %v2403_v1, %v487_v4  ;;  %553 = vperm.xlu1 (!%p2130_p4), %2386, %v535_v5   ;;  %v2517_v15 = vmov (!%p2130_p4), 6   ;;  %v2518_v16 = vmov (!%p2130_p4), 3   ;;  %vm694_vm4 = vcmask (!%p2130_p4), 89088  }
  0x13   : > { %v695_v17 = vsel (!%p2130_p4), %vm694_vm4, %v535_v5, 0.0  ;;  %v696_v18 = vsel (!%p2130_p4), %vm694_vm4, %v536_v10, 0.0  ;;  %v2519_v19 = vmov (!%p2130_p4), 7   ;;  %v2520_v21 = vmov (!%p2130_p4), 9  }
  0x14   : > { %2288 = vmatpush3.bf16.msra.mxu0 (!%p2130_p4), %v489_v6  ;;  %v697_v20 = vpack.c.bf16 (!%p2130_p4), %v696_v18, %v695_v17  ;;  %v2522_v22 = vmov (!%p2130_p4), 10   ;;  %vm532_vm5 = vcmask (!%p2130_p4), 261120   ;;  %vm561_vm6 = vcmask (!%p2130_p4), 523520  }
  0x15   : > { %544 = vperm.xlu0 %2385, %v536_v10   ;;  %vm576_vm7 = vcmask 785920   ;;  %vm591_vm8 = vcmask 1048320  }
  0x16   : > { %558 = vperm.xlu1 %2386, %v536_v10  }
  0x17   : > { %2290 = vmatmul.mubr.msk.bf16.vlgmr.msra.gmra.mrb[0].mxu0 %vm480_vm3, %v2404_v9 }
  0x19   : > { %2387 = vset.pattern.permute.xlu0 %v2513_v11 }
  0x1a   : > { %2388 = vset.pattern.permute.xlu1 %v2513_v11  ;;  %568 = vperm.xlu0 %2387, %v535_v5  }
  0x1b   : > { %573 = vperm.xlu1 %2388, %v536_v10  }
  0x1e   : > { %2390 = vset.pattern.permute.xlu0 %v2514_v12 }
  0x1f   : > { %2389 = vset.pattern.permute.xlu1 %v2514_v12  ;;  %603 = vperm.xlu0 %2390, %v536_v10  }
  0x20   : > { %598 = vperm.xlu1 %2389, %v535_v5  }
  0x23   : > { %2392 = vset.pattern.permute.xlu0 %v2515_v13 }
  0x24   : > { %2391 = vset.pattern.permute.xlu1 %v2516_v14  ;;  %654 = vperm.xlu0 %2392, %v535_v5  }
  0x25   : > { %612 = vperm.xlu1 %2391, %v535_v5  }
  0x28   : > { %2395 = vset.pattern.permute.xlu0 %v2517_v15 }
  0x29   : > { %617 = vperm.xlu1 %2391, %v536_v10   ;;  %631 = vperm.xlu0 %2395, %v536_v10  }
  0x2d   : > { %2393 = vset.pattern.permute.xlu1 %v2515_v13  ;;  %2397 = vset.pattern.permute.xlu0 %v2518_v16 }
  0x2e   : > { %659 = vperm.xlu1 %2393, %v536_v10   ;;  %583 = vperm.xlu0 %2397, %v535_v5  }
  0x32   : > { %2394 = vset.pattern.permute.xlu1 %v2517_v15  ;;  %2400 = vset.pattern.permute.xlu0 %v2519_v19 }
  0x33   : > { %626 = vperm.xlu1 %2394, %v535_v5   ;;  %645 = vperm.xlu0 %2400, %v536_v10  }
  0x37   : > { %2396 = vset.pattern.permute.xlu1 %v2520_v21  ;;  %699 = vrot.lane.b32.xlu0 %v697_v20, %s2521_s17 }
  0x38   : > { %668 = vperm.xlu1 %2396, %v535_v5   ;;  %2402 = vset.pattern.permute.xlu0 %v2522_v22 }
  0x3c   : > { %673 = vperm.xlu1 %2396, %v536_v10  }
  0x40   : > { %2398 = vset.pattern.permute.xlu1 %v2518_v16 }
  0x41   : > { %588 = vperm.xlu1 %2398, %v536_v10  }
  0x45   : > { %2399 = vset.pattern.permute.xlu1 %v2519_v19 }
  0x46   : > { %640 = vperm.xlu1 %2399, %v535_v5  }
  0x4a   : > { %2401 = vset.pattern.permute.xlu1 %v2522_v22 }
  0x4b   : > { %682 = vperm.xlu1 %2401, %v535_v5  }
  0x4f   : > { %687 = vperm.xlu1 %2401, %v536_v10  }
  0x90   : > { %v540_v23 = vpop.permute.xlu0 %539 }
  0x91   : > { %v554_v24 = vpop.permute.xlu1 %553  ;;  %547 = vst.msk [vmem:[#allocation3] sm:$0xff] %vm532_vm5, %v540_v23 }
  0x92   : > { %562 = vst.msk [vmem:[#allocation3] sm:$0xff] %vm561_vm6, %v554_v24 }
  0x94   : > { %v545_v25 = vpop.permute.xlu0 %544 }
  0x95   : > { %548 = vst.msk [vmem:[#allocation3 + $0x18] sm:$0xff] %vm532_vm5, %v545_v25  ;;  %v559_v26 = vpop.permute.xlu1 %558 }
  0x96   : > { %563 = vst.msk [vmem:[#allocation3 + $0x18] sm:$0xff] %vm561_vm6, %v559_v26 }
  0x99   : > { %v569_v27 = vpop.permute.xlu0 %568 }
  0x9a   : > { %v574_v28 = vpop.permute.xlu1 %573  ;;  %577 = vst.msk [vmem:[#allocation3] sm:$0xff] %vm576_vm7, %v569_v27 }
  0x9b   : > { %578 = vst.msk [vmem:[#allocation3 + $0x18] sm:$0xff] %vm576_vm7, %v574_v28 }
  0x9e   : > { %v604_v29 = vpop.permute.xlu0 %603 }
  0x9f   : > { %v599_v30 = vpop.permute.xlu1 %598  ;;  %607 = vst.msk [vmem:[#allocation3 + $0x20] sm:$0xff] %vm532_vm5, %v604_v29 }
  0xa0   : > { %606 = vst.msk [vmem:[#allocation3 + $0x8] sm:$0xff] %vm532_vm5, %v599_v30 }
  0xa3   : > { %v655_v31 = vpop.permute.xlu0 %654 }
  0xa4   : > { %v613_v32 = vpop.permute.xlu1 %612  ;;  %662 = vst.msk [vmem:[#allocation3 + $0x10] sm:$0xff] %vm532_vm5, %v655_v31 }
  0xa5   : > { %620 = vst.msk [vmem:[#allocation3 + $0x8] sm:$0xff] %vm561_vm6, %v613_v32 }
  0xa8   : > { %v618_v33 = vpop.permute.xlu1 %617  ;;  %v632_v34 = vpop.permute.xlu0 %631 }
  0xa9   : > { %621 = vst.msk [vmem:[#allocation3 + $0x20] sm:$0xff] %vm561_vm6, %v618_v33 }
  0xaa   : > { %635 = vst.msk [vmem:[#allocation3 + $0x20] sm:$0xff] %vm576_vm7, %v632_v34 }
  0xad   : > { %v660_v35 = vpop.permute.xlu1 %659  ;;  %v584_v36 = vpop.permute.xlu0 %583 }
  0xae   : > { %663 = vst.msk [vmem:[#allocation3 + $0x28] sm:$0xff] %vm532_vm5, %v660_v35 }
  0xaf   : > { %592 = vst.msk [vmem:[#allocation3] sm:$0xff] %vm591_vm8, %v584_v36 }
  0xb2   : > { %v627_v37 = vpop.permute.xlu1 %626  ;;  %v646_v38 = vpop.permute.xlu0 %645 }
  0xb3   : > { %634 = vst.msk [vmem:[#allocation3 + $0x8] sm:$0xff] %vm576_vm7, %v627_v37 }
  0xb4   : > { %649 = vst.msk [vmem:[#allocation3 + $0x20] sm:$0xff] %vm591_vm8, %v646_v38 }
  0xb6   : > { %v700_v39 = vpop.permute.xlu0 %699 }
  0xb7   : > { %v669_v40 = vpop.permute.xlu1 %668  ;;  %702 = vst.msk [vmem:[#allocation5 + $0x28] sm:$0xff] %vm576_vm7, %v700_v39 }
  0xb8   : > { %676 = vst.msk [vmem:[#allocation3 + $0x10] sm:$0xff] %vm561_vm6, %v669_v40 }
  0xbb   : > { %v674_v41 = vpop.permute.xlu1 %673 }
  0xbc   : > { %677 = vst.msk [vmem:[#allocation3 + $0x28] sm:$0xff] %vm561_vm6, %v674_v41 }
  0xc0   : > { %v589_v42 = vpop.permute.xlu1 %588 }
  0xc1   : > { %593 = vst.msk [vmem:[#allocation3 + $0x18] sm:$0xff] %vm591_vm8, %v589_v42 }
  0xc5   : > { %v641_v43 = vpop.permute.xlu1 %640 }
  0xc6   : > { %648 = vst.msk [vmem:[#allocation3 + $0x8] sm:$0xff] %vm591_vm8, %v641_v43 }
  0xca   : > { %v683_v44 = vpop.permute.xlu1 %682 }
  0xcb   : > { %690 = vst.msk [vmem:[#allocation3 + $0x10] sm:$0xff] %vm576_vm7, %v683_v44 }
  0xce   : > { %v688_v45 = vpop.permute.xlu1 %687 }
  0xcf   : > { %691 = vst.msk [vmem:[#allocation3 + $0x28] sm:$0xff] %vm576_vm7, %v688_v45 }
  0xea   : > { %v525_v46 = vpop.f32.mrb[0].mxu0 }
  0xeb   : > { %533 = vst.msk [vmem:[#allocation2] sm:$0xff] %vm532_vm5, %v525_v46  ;;  %v2291_v47 = vpop.f32.mrb[1].mxu0 }
  0xec   : > { %v528_v48 = vpop.f32.mrb[2].mxu0 }
  0xed   : > { %534 = vst.msk [vmem:[#allocation2 + $0x8] sm:$0xff] %vm532_vm5, %v528_v48  ;;  %v2292_v49 = vpop.f32.mrb[3].mxu0 }
  0xee PF: > { %v2523_v52 = vmov 0.0   ;;  %vm2524_vm9 = vmmov 0   ;;  %v2405_v56 = vld [vmem:[%s3086_s2] sm:$0xff]   ;;  %vm717_vm10 = vcmask 130048   ;;  %v2408_v57 = vld [vmem:[%s3086_s2 + $0x18] sm:$0xff]   ;;  %v2406_v58 = vld [vmem:[%s3086_s2 + $0x8] sm:$0xff]  }
  0xef   : > { %2293 = vmatprep.subr.bf16.mxu0 %v2523_v52  ;;  %2295 = vmatprep.mubr.msk.bf16.mxu0 %vm2524_vm9, %v2523_v52  ;;  %v2407_v59 = vld [vmem:[%s3086_s2 + $0x10] sm:$0xff]   ;;  %v2409_v60 = vld [vmem:[%s2625_s18] sm:$0xff]   ;;  %vm708_vm11 = vcmask 261120   ;;  %v2525_v61 = vmov 0   ;;  %v2410_v62 = vld [vmem:[%s2625_s18 + $0x8] sm:$0xff]   ;;  %s2526_s15 = smov 32  }
  0xf0   : > { %2311 = vmatprep.subr.bf16.mxu1 %v2523_v52  ;;  %2313 = vmatprep.mubr.msk.bf16.mxu1 %vm2524_vm9, %v2523_v52  ;;  %v2411_v63 = vld [vmem:[%s2625_s18 + $0x10] sm:$0xff]   ;;  %v2412_v0 = vld [vmem:[%s2625_s18 + $0x18] sm:$0xff]   ;;  %v2413_v1 = vld [vmem:[%s2625_s18 + $0x20] sm:$0xff]   ;;  %s2527_s16 = smov 64   ;;  %s2528_s17 = smov 96   ;;  %vm767_vm12 = vcmask 523520  }
  0xf1   : > { %v2414_v2 = vld [vmem:[%s2625_s18 + $0x28] sm:$0xff]   ;;  %v2415_v3 = vld [vmem:[%s2625_s18 + $0x30] sm:$0xff]   ;;  %v2416_v8 = vld [vmem:[%s2625_s18 + $0x38] sm:$0xff]   ;;  %vm826_vm13 = vcmask 785920   ;;  %vm885_vm14 = vcmask 1048320   ;;  %vm1740_vm15 = vcmask 785408  }
  0xf2   : > { %v703_v50 = vld [vmem:[#allocation2] sm:$0xff]  ;;  %v2418_v18 = vld [vmem:[%s2625_s18 + $0x48] sm:$0xff]   ;;  %v2716_v24 = vld [vmem:[#allocation3 + $0x20] sm:$0xff]  ;;  %p2209_p5 = scmp.ne.s32.totalorder %s2608_s26, 1 }
  0xf3   : > { %v705_v53 = vmax.f32 %v703_v50, 0.0  ;;  %v2417_v15 = vld [vmem:[%s2625_s18 + $0x40] sm:$0xff]   ;;  %v2720_v27 = vld [vmem:[#allocation3 + $0x18] sm:$0xff]  ;;  %v2725_v30 = vld [vmem:[#allocation3 + $0x8] sm:$0xff]  ;;  %vm2530_vm0 = vmmov (!%p2209_p5), 0   ;;  %vm2055_vm1 = vcmask (!%p2209_p5), 25600  }
  0xf4   : > { %v704_v51 = vld [vmem:[#allocation2 + $0x8] sm:$0xff]  ;;  %v2731_v31 = vld [vmem:[#allocation3] sm:$0xff]  ;;  %v2745_v32 = vld [vmem:[#allocation3 + $0x28] sm:$0xff] }
  0xf5   : > { %v706_v54 = vmax.f32 %v704_v51, 0.0  ;;  %v2755_v33 = vld [vmem:[#allocation3 + $0x10] sm:$0xff] }
  0xf6   : > { %v2148_v51 = vld [vmem:[%s455_s14] ss:$0 sm:$0xff] }
  0xf7   : > { %v707_v55 = vpack.c.bf16 %v706_v54, %v705_v53 }
  0xf9   : > { %2294 = vmatpush3.bf16.msra.mxu0 %v707_v55  ;;  %2312 = vmatpush3.bf16.msra.mxu1 %v707_v55  ;;  %709 = vst.msk [vmem:[#allocation4] sm:$0xff] %vm708_vm11, %v707_v55 }
  0xfa   : > { %2299 = vmatprep.subr.bf16.mxu0 %v2523_v52  ;;  %2317 = vmatprep.subr.bf16.mxu1 %v2523_v52 }
  0xfc   : > { %2296 = vmatmul.mubr.msk.bf16.vlgmr.msra.gmra.mrb[0].mxu0 %vm717_vm10, %v2405_v56  ;;  %2314 = vmatmul.mubr.msk.bf16.vlgmr.msra.gmra.mrb[0].mxu1 %vm717_vm10, %v2408_v57 }
  0xfd   : > { %2300 = vmatpush3.bf16.msra.mxu0 %v707_v55  ;;  %2301 = vmatprep.mubr.msk.bf16.mxu0 %vm2524_vm9, %v2523_v52 }
  0xfe   : > { %2305 = vmatprep.subr.bf16.mxu0 %v2523_v52  ;;  %2319 = vmatprep.mubr.msk.bf16.mxu1 %vm2524_vm9, %v2523_v52 }
 0x104   : > { %2302 = vmatmul.mubr.msk.bf16.vlgmr.msra.gmra.mrb[4].mxu0 %vm717_vm10, %v2406_v58 }
 0x105   : > { %2306 = vmatpush3.bf16.msra.mxu0 %v707_v55  ;;  %2307 = vmatprep.mubr.msk.bf16.mxu0 %vm2524_vm9, %v2523_v52 }
 0x106   : > { %1033 = vmatprep.subr.bf16.mxu0 %v2525_v61 }
 0x10c   : > { %2308 = vmatmul.mubr.msk.bf16.vlgmr.msra.gmra.mrb[8].mxu0 %vm717_vm10, %v2407_v59 }
 0x10d   : > { %1034 = vmatpush1.bf16.msra.mxu0 %v2409_v60 }
 0x10e   : > { %1035 = vmatprep.subr.bf16.mxu0 %v2525_v61 }
 0x111   : > { %1036 = vmatpush1.bf16.msra.mxu0 %v2410_v62 }
 0x112   : > { %1037 = vmatprep.subr.bf16.mxu0 %v2525_v61 }
 0x115   : > { %1038 = vmatpush1.bf16.msra.mxu0 %v2411_v63 }
 0x116   : > { %1039 = vmatprep.subr.bf16.mxu0 %v2525_v61 }
 0x119   : > { %1040 = vmatpush1.bf16.msra.mxu0 %v2412_v0 }
 0x11a   : > { %1041 = vmatprep.subr.bf16.mxu0 %v2525_v61 }
 0x11d   : > { %1042 = vmatpush1.bf16.msra.mxu0 %v2413_v1 }
 0x11e   : > { %1043 = vmatprep.subr.bf16.mxu0 %v2525_v61 }
 0x121   : > { %1044 = vmatpush1.bf16.msra.mxu0 %v2414_v2 }
 0x122   : > { %1045 = vmatprep.subr.bf16.mxu0 %v2525_v61 }
 0x125   : > { %1046 = vmatpush1.bf16.msra.mxu0 %v2415_v3 }
 0x126   : > { %1047 = vmatprep.subr.bf16.mxu0 %v2525_v61 }
 0x129   : > { %1048 = vmatpush1.bf16.msra.mxu0 %v2416_v8 }
 0x12a   : > { %1049 = vmatprep.subr.bf16.mxu0 %v2525_v61 }
 0x12d   : > { %1050 = vmatpush1.bf16.msra.mxu0 %v2417_v15 }
 0x12e   : > { %1051 = vmatprep.subr.bf16.mxu0 %v2525_v61 }
 0x131   : > { %1052 = vmatpush1.bf16.msra.mxu0 %v2418_v18 }
 0x1cf   : > { %v755_v4 = vpop.f32.mrb[0].mxu0  ;;  %v932_v5 = vpop.f32.mrb[0].mxu1 }
 0x1d0   : > { %v2297_v6 = vpop.f32.mrb[1].mxu0  ;;  %v2315_v7 = vpop.f32.mrb[1].mxu1 }
 0x1d1   : > { %v758_v9 = vpop.f32.mrb[2].mxu0  ;;  %v935_v10 = vpop.f32.mrb[2].mxu1 }
 0x1d2   : > { %v762_v11 = vpack.c.bf16 %v758_v9, %v755_v4  ;;  %v2298_v12 = vpop.f32.mrb[3].mxu0  ;;  %v939_v13 = vpack.c.bf16 %v935_v10, %v932_v5  ;;  %v2316_v14 = vpop.f32.mrb[3].mxu1 }
 0x1d4   : > { %764 = vrot.lane.b32.xlu0 %v762_v11, %s2526_s15  ;;  %940 = vst.msk [vmem:[#allocation4 + $0x8] sm:$0xff] %vm708_vm11, %v939_v13  ;;  %v2419_v11 = vld [vmem:[%s3087_s3] sm:$0xff]  }
 0x1d7   : > { %v814_v16 = vpop.f32.mrb[4].mxu0 }
 0x1d8   : > { %v2303_v17 = vpop.f32.mrb[5].mxu0 }
 0x1d9   : > { %v817_v19 = vpop.f32.mrb[6].mxu0 }
 0x1da   : > { %v821_v20 = vpack.c.bf16 %v817_v19, %v814_v16  ;;  %v2304_v21 = vpop.f32.mrb[7].mxu0 }
 0x1db   : > { %v942_v22 = vld [vmem:[#allocation4 + $0x8] sm:$0xff] }
 0x1dc   : > { %823 = vrot.lane.b32.xlu0 %v821_v20, %s2527_s16  ;;  %2159 = vmatprep.mubr.msk.bf16.mxu0 %vm708_vm11, %v942_v22 }
 0x1df   : > { %v873_v23 = vpop.f32.mrb[8].mxu0 }
 0x1e0   : > { %v2309_v25 = vpop.f32.mrb[9].mxu0  ;;  %1236 = vrot.lane.b32.xlu0 %v2716_v24, %s2528_s17 }
 0x1e1   : > { %v876_v26 = vpop.f32.mrb[10].mxu0 }
 0x1e2   : > { %v880_v28 = vpack.c.bf16 %v876_v26, %v873_v23  ;;  %v2310_v29 = vpop.f32.mrb[11].mxu0 }
 0x1e4   : > { %882 = vrot.lane.b32.xlu1 %v880_v28, %s2528_s17  ;;  %1148 = vrot.lane.b32.xlu0 %v2720_v27, %s2528_s17 }
 0x1e8   : > { %1234 = vrot.lane.b32.xlu1 %v2725_v30, %s2528_s17  ;;  %1258 = vrot.lane.b32.xlu0 %v2716_v24, %s2527_s16 }
 0x1ec   : > { %1146 = vrot.lane.b32.xlu1 %v2731_v31, %s2528_s17  ;;  %1170 = vrot.lane.b32.xlu0 %v2720_v27, %s2527_s16 }
 0x1f0   : > { %1256 = vrot.lane.b32.xlu1 %v2725_v30, %s2527_s16  ;;  %1284 = vrot.lane.b32.xlu0 %v2716_v24, %s2526_s15 }
 0x1f4   : > { %1168 = vrot.lane.b32.xlu1 %v2731_v31, %s2527_s16  ;;  %1196 = vrot.lane.b32.xlu0 %v2720_v27, %s2526_s15 }
 0x1f8   : > { %1282 = vrot.lane.b32.xlu1 %v2725_v30, %s2526_s15  ;;  %1324 = vrot.lane.b32.xlu0 %v2745_v32, %s2528_s17 }
 0x1fc   : > { %1194 = vrot.lane.b32.xlu1 %v2731_v31, %s2526_s15  ;;  %1346 = vrot.lane.b32.xlu0 %v2745_v32, %s2527_s16 }
 0x200   : > { %1322 = vrot.lane.b32.xlu1 %v2755_v33, %s2528_s17 }
 0x204   : > { %1344 = vrot.lane.b32.xlu1 %v2755_v33, %s2527_s16 }
 0x246   : > { %v765_v34 = vpop.permute.xlu0 %764 }
 0x247   : > { %768 = vst.msk [vmem:[#allocation4] sm:$0xff] %vm767_vm12, %v765_v34 }
 0x24e   : > { %v824_v35 = vpop.permute.xlu0 %823 }
 0x24f   : > { %827 = vst.msk [vmem:[#allocation4] sm:$0xff] %vm826_vm13, %v824_v35 }
 0x252   : > { %v2766_v39 = vpop.permute.xlu0 %1236 }
 0x256   : > { %v883_v36 = vpop.permute.xlu1 %882  ;;  %v2770_v41 = vpop.permute.xlu0 %1148 }
 0x257   : > { %886 = vst.msk [vmem:[#allocation4] sm:$0xff] %vm885_vm14, %v883_v36 }
 0x25a   : > { %v2764_v38 = vpop.permute.xlu1 %1234  ;;  %v2774_v43 = vpop.permute.xlu0 %1258 }
 0x25e   : > { %v941_v37 = vld [vmem:[#allocation4] sm:$0xff]  ;;  %v2768_v40 = vpop.permute.xlu1 %1146  ;;  %v2778_v45 = vpop.permute.xlu0 %1170 }
 0x25f   : > { %1066 = vmatmul.mubr.bf16.vlgmr.msra.gmra.mrb[12].mxu0 %v941_v37 }
 0x262   : > { %v2772_v42 = vpop.permute.xlu1 %1256  ;;  %v2782_v47 = vpop.permute.xlu0 %1284 }
 0x266   : > { %v2776_v44 = vpop.permute.xlu1 %1168  ;;  %v2786_v49 = vpop.permute.xlu0 %1196 }
 0x26a   : > { %v2780_v46 = vpop.permute.xlu1 %1282  ;;  %v2795_v52 = vpop.permute.xlu0 %1324 }
 0x26e   : > { %v2784_v48 = vpop.permute.xlu1 %1194  ;;  %v2799_v62 = vpop.permute.xlu0 %1346 }
 0x272   : > { %v2788_v50 = vpop.permute.xlu1 %1322 }
 0x276   : > { %v2797_v57 = vpop.permute.xlu1 %1344 }
 0x332   : > { %v1067_v53 = vpop.f32.mrb[12].mxu0 }
 0x333   : > { %v1068_v54 = vadd.f32 %v2148_v51, %v1067_v53  ;;  %v1069_v55 = vpop.f32.mrb[13].mxu0 }
 0x334   : > { %v1070_v56 = vpop.f32.mrb[14].mxu0  ;;  %v2420_v55 = vld [vmem:[%s2630_s21 + $0x40] sm:$0xff]  }
 0x335   : > { %v1074_v58 = vmax.f32 %v1068_v54, 0.0  ;;  %v1071_v59 = vadd.f32 %v2148_v51, %v1070_v56  ;;  %v1072_v60 = vpop.f32.mrb[15].mxu0  ;;  %v2421_v56 = vld [vmem:[%s2630_s21] sm:$0xff]  }
 0x336   : > { %v2423_v60 = vld [vmem:[%s2630_s21 + $0x8] sm:$0xff]  }
 0x337   : > { %v1075_v63 = vmax.f32 %v1071_v59, 0.0  ;;  %v2802_v0 = vmul.f32 %v2797_v57, %v1074_v58  ;;  %v2805_v1 = vmul.f32 %v2731_v31, %v1074_v58  ;;  %v2808_v2 = vmul.f32 %v2776_v44, %v1074_v58  ;;  %v2428_v59 = vld [vmem:[%s2630_s21 + $0xc0] sm:$0xff]  }
 0x338   : > { %v2811_v3 = vmul.f32 %v2784_v48, %v1074_v58  ;;  %v2814_v4 = vmul.f32 %v2725_v30, %v1074_v58  ;;  %v2817_v5 = vmul.f32 %v2772_v42, %v1074_v58  ;;  %v2820_v6 = vmul.f32 %v2780_v46, %v1074_v58  ;;  %2257 = vmatprep.subr.bf16.mxu0 %v2428_v59 }
 0x339   : > { %v2823_v7 = vmul.f32 %v2799_v62, %v1075_v63  ;;  %v1076_v8 = vpack.c.bf16 %v1075_v63, %v1074_v58  ;;  %v2826_v9 = vmul.f32 %v2720_v27, %v1075_v63  ;;  %v2829_v10 = vmul.f32 %v2778_v45, %v1075_v63 }
 0x33a   : > { %v2835_v12 = vmul.f32 %v2786_v49, %v1075_v63  ;;  %v2838_v13 = vmul.f32 %v2716_v24, %v1075_v63  ;;  %v2841_v14 = vmul.f32 %v2774_v43, %v1075_v63  ;;  %v2844_v15 = vmul.f32 %v2782_v47, %v1075_v63 }
 0x33b   : > { %v1360_v16 = vpack.c.bf16 %v2823_v7, %v2802_v0  ;;  %2318 = vmatpush3.bf16.msra.mxu1 %v1076_v8  ;;  %v1136_v17 = vpack.c.bf16 %v2826_v9, %v2805_v1  ;;  %v1184_v18 = vpack.c.bf16 %v2829_v10, %v2808_v2  ;;  %v2861_v23 = vmul.f32 %v2755_v33, %v1074_v58  ;;  %v2424_v8 = vld [vmem:[%s2630_s21 + $0x50] sm:$0xff]   ;;  %v2447_v9 = vld [vmem:[%s2630_s21 + $0x100] sm:$0xff]  }
 0x33c   : > { %v1210_v19 = vpack.c.bf16 %v2835_v12, %v2811_v3  ;;  %v1224_v20 = vpack.c.bf16 %v2838_v13, %v2814_v4  ;;  %v1272_v21 = vpack.c.bf16 %v2841_v14, %v2817_v5  ;;  %v1298_v22 = vpack.c.bf16 %v2844_v15, %v2820_v6  ;;  %2235 = vmatprep.subr.bf16.mxu1 %v2420_v55  ;;  %v2437_v55 = vld [vmem:[%s2630_s21 + $0x90] sm:$0xff]   ;;  %v2450_v15 = vld [vmem:[%s2630_s21 + $0x108] sm:$0xff]  }
 0x33d   : > { %v2864_v25 = vmul.f32 %v2745_v32, %v1075_v63  ;;  %v1160_v26 = vmul.f32 %v2768_v40, %v1074_v58  ;;  %v1161_v28 = vmul.f32 %v2770_v41, %v1075_v63  ;;  %v1248_v29 = vmul.f32 %v2764_v38, %v1074_v58 }
 0x33e   : > { %2320 = vmatmul.mubr.msk.bf16.vlgmr.msra.gmra.mrb[4].mxu1 %vm717_vm10, %v2419_v11  ;;  %v1249_v34 = vmul.f32 %v2766_v39, %v1075_v63  ;;  %v1336_v35 = vmul.f32 %v2788_v50, %v1074_v58  ;;  %v1337_v36 = vmul.f32 %v2795_v52, %v1075_v63  ;;  %v2422_v58 = vld [vmem:[%s2630_s21 + $0x48] sm:$0xff]   ;;  %v2429_v63 = vld [vmem:[%s2630_s21 + $0x80] sm:$0xff]   ;;  %v2425_v11 = vld [vmem:[%s2630_s21 + $0x10] sm:$0xff]  }
 0x33f   : > { %v1312_v37 = vpack.c.bf16 %v2864_v25, %v2861_v23  ;;  %v1162_v51 = vpack.c.bf16 %v1161_v28, %v1160_v26  ;;  %2236 = vmatpush3.bf16.msra.mxu1 %v2421_v56  ;;  %2258 = vmatpush3.bf16.msra.mxu0 %v2429_v63  ;;  %v2426_v26 = vld [vmem:[%s2630_s21 + $0x58] sm:$0xff]  }
 0x340   : > { %v1250_v53 = vpack.c.bf16 %v1249_v34, %v1248_v29  ;;  %v1338_v54 = vpack.c.bf16 %v1337_v36, %v1336_v35  ;;  %2237 = vmatprep.subr.bf16.mxu1 %v2422_v58  ;;  %v2427_v28 = vld [vmem:[%s2630_s21 + $0x18] sm:$0xff]   ;;  %v2430_v29 = vld [vmem:[%s2630_s21 + $0x60] sm:$0xff]   ;;  %v2432_v35 = vld [vmem:[%s2630_s21 + $0xc8] sm:$0xff]  }
 0x341   : > { %1163 = vst.msk [vmem:[#allocation5 + $0x18] sm:$0xff] %vm708_vm11, %v1162_v51  ;;  %v2431_v34 = vld [vmem:[%s2630_s21 + $0x20] sm:$0xff]   ;;  %v2433_v36 = vld [vmem:[%s2630_s21 + $0x88] sm:$0xff]   ;;  %2259 = vmatprep.subr.bf16.mxu0 %v2432_v35  ;;  %v2440_v35 = vld [vmem:[%s2630_s21 + $0xd8] sm:$0xff]  }
 0x342   : > { %1251 = vst.msk [vmem:[#allocation5 + $0x20] sm:$0xff] %vm708_vm11, %v1250_v53  ;;  %1339 = vst.msk [vmem:[#allocation5 + $0x28] sm:$0xff] %vm708_vm11, %v1338_v54  ;;  %v2434_v51 = vld [vmem:[%s2630_s21 + $0x68] sm:$0xff]   ;;  %v2436_v54 = vld [vmem:[%s2630_s21 + $0xd0] sm:$0xff]  }
 0x343   : > { %2238 = vmatpush3.bf16.msra.mxu1 %v2423_v60  ;;  %2260 = vmatpush3.bf16.msra.mxu0 %v2433_v36  ;;  %v2435_v53 = vld [vmem:[%s2630_s21 + $0x28] sm:$0xff]  }
 0x344   : > { %2239 = vmatprep.subr.bf16.mxu1 %v2424_v8  ;;  %2261 = vmatprep.subr.bf16.mxu0 %v2436_v54  ;;  %v2441_v54 = vld [vmem:[%s2630_s21 + $0x98] sm:$0xff]  }
 0x347   : > { %2240 = vmatpush3.bf16.msra.mxu1 %v2425_v11  ;;  %2262 = vmatpush3.bf16.msra.mxu0 %v2437_v55 }
 0x348   : > { %2241 = vmatprep.subr.bf16.mxu1 %v2426_v26  ;;  %2263 = vmatprep.subr.bf16.mxu0 %v2440_v35  ;;  %v2457_v35 = vld [vmem:[%s2630_s21 + $0x128] sm:$0xff]  }
 0x34b   : > { %2242 = vmatpush3.bf16.msra.mxu1 %v2427_v28  ;;  %2264 = vmatpush3.bf16.msra.mxu0 %v2441_v54 }
 0x34c   : > { %2243 = vmatprep.subr.bf16.mxu1 %v2430_v29 }
 0x34f   : > { %2244 = vmatpush3.bf16.msra.mxu1 %v2431_v34 }
 0x350   : > { %2245 = vmatprep.subr.bf16.mxu1 %v2434_v51 }
 0x353   : > { %2246 = vmatpush3.bf16.msra.mxu1 %v2435_v53 }
 0x411   : > { %v1121_v56 = vpop.f32.mrb[4].mxu1 }
 0x412   : > { %v2321_v58 = vpop.f32.mrb[5].mxu1  ;;  %v1240_v59 = vmul.f32 %v2764_v38, %v1121_v56  ;;  %v1152_v60 = vmul.f32 %v2768_v40, %v1121_v56  ;;  %v1262_v63 = vmul.f32 %v2772_v42, %v1121_v56  ;;  %v1174_v8 = vmul.f32 %v2776_v44, %v1121_v56  ;;  %v2438_v38 = vld [vmem:[%s2630_s21 + $0x70] sm:$0xff]  }
 0x413   : > { %v1124_v11 = vpop.f32.mrb[6].mxu1  ;;  %v1288_v26 = vmul.f32 %v2780_v46, %v1121_v56  ;;  %v1200_v28 = vmul.f32 %v2784_v48, %v1121_v56  ;;  %v2903_v29 = vmul.f32 %v2788_v50, %v1121_v56  ;;  %v2906_v34 = vmul.f32 %v2797_v57, %v1121_v56  ;;  %v2439_v40 = vld [vmem:[%s2630_s21 + $0x30] sm:$0xff]   ;;  %2247 = vmatprep.subr.bf16.mxu1 %v2438_v38 }
 0x414   : > { %v2322_v42 = vpop.f32.mrb[7].mxu1  ;;  %v1241_v44 = vmul.f32 %v2766_v39, %v1124_v11  ;;  %v1153_v36 = vmul.f32 %v2770_v41, %v1124_v11  ;;  %v1263_v46 = vmul.f32 %v2774_v43, %v1124_v11  ;;  %v1175_v48 = vmul.f32 %v2778_v45, %v1124_v11  ;;  %2248 = vmatpush3.bf16.msra.mxu1 %v2439_v40  ;;  %v2456_v40 = vld [vmem:[%s2630_s21 + $0x120] sm:$0xff]  }
 0x415   : > { %v1289_v50 = vmul.f32 %v2782_v47, %v1124_v11  ;;  %v1201_v51 = vmul.f32 %v2786_v49, %v1124_v11  ;;  %v1329_v57 = vmul.f32 %v2795_v52, %v1124_v11  ;;  %v1351_v53 = vmul.f32 %v2799_v62, %v1124_v11 }
 0x416   : > { %v1242_v55 = vpack.c.bf16 %v1241_v44, %v1240_v59  ;;  %v1154_v39 = vpack.c.bf16 %v1153_v36, %v1152_v60  ;;  %v1264_v58 = vpack.c.bf16 %v1263_v46, %v1262_v63  ;;  %v1176_v41 = vpack.c.bf16 %v1175_v48, %v1174_v8  ;;  %v2442_v59 = vld [vmem:[%s2630_s21 + $0x78] sm:$0xff]   ;;  %v2458_v44 = vld [vmem:[%s2630_s21 + $0x130] sm:$0xff]   ;;  %v2460_v46 = vld [vmem:[%s2630_s21 + $0x140] sm:$0xff]  }
 0x417   : > { %v1290_v43 = vpack.c.bf16 %v1289_v50, %v1288_v26  ;;  %v1202_v45 = vpack.c.bf16 %v1201_v51, %v1200_v28  ;;  %v1330_v47 = vpack.c.bf16 %v1329_v57, %v2903_v29  ;;  %v1352_v49 = vpack.c.bf16 %v1351_v53, %v2906_v34  ;;  %v2443_v60 = vld [vmem:[%s2630_s21 + $0x38] sm:$0xff]   ;;  %v2444_v29 = vld [vmem:[%s2630_s21 + $0xe0] sm:$0xff]   ;;  %2249 = vmatprep.subr.bf16.mxu1 %v2442_v59  ;;  %v2461_v48 = vld [vmem:[%s2630_s21 + $0x148] sm:$0xff]  }
 0x418   : > { %1244 = vrot.lane.b32.xlu1 %v1242_v55, %s2526_s15  ;;  %1156 = vrot.lane.b32.xlu0 %v1154_v39, %s2526_s15  ;;  %v2925_v52 = vmul.f32 %v2755_v33, %v1121_v56  ;;  %v2928_v62 = vmul.f32 %v2745_v32, %v1124_v11  ;;  %v1218_v63 = vmul.f32 %v2725_v30, %v1121_v56  ;;  %v2445_v34 = vld [vmem:[%s2630_s21 + $0xa0] sm:$0xff]   ;;  %v2449_v30 = vld [vmem:[%s2630_s21 + $0xf0] sm:$0xff]  }
 0x419   : > { %v1219_v8 = vmul.f32 %v2716_v24, %v1124_v11  ;;  %v1130_v26 = vmul.f32 %v2731_v31, %v1121_v56  ;;  %v1131_v28 = vmul.f32 %v2720_v27, %v1124_v11  ;;  %2250 = vmatpush3.bf16.msra.mxu1 %v2443_v60  ;;  %2265 = vmatprep.subr.bf16.mxu0 %v2444_v29  ;;  %v2446_v24 = vld [vmem:[%s2630_s21 + $0xe8] sm:$0xff]   ;;  %v2451_v31 = vld [vmem:[%s2630_s21 + $0xb0] sm:$0xff]   ;;  %v2452_v56 = vld [vmem:[%s2630_s21 + $0xf8] sm:$0xff]  }
 0x41a   : > { %v1308_v33 = vpack.c.bf16 %v2928_v62, %v2925_v52  ;;  %2266 = vmatpush3.bf16.msra.mxu0 %v2445_v34  ;;  %1826 = vmatprep.subr.bf16.mxu1 %v2525_v61  ;;  %v2448_v27 = vld [vmem:[%s2630_s21 + $0xa8] sm:$0xff]   ;;  %v2454_v11 = vld [vmem:[%s2630_s21 + $0xb8] sm:$0xff]   ;;  %v2462_v50 = vld [vmem:[%s2630_s21 + $0x150] sm:$0xff]  }
 0x41b   : > { %v1220_v32 = vpack.c.bf16 %v1219_v8, %v1218_v63  ;;  %v1132_v38 = vpack.c.bf16 %v1131_v28, %v1130_v26  ;;  %2267 = vmatprep.subr.bf16.mxu0 %v2446_v24  ;;  %v2459_v36 = vld [vmem:[%s2630_s21 + $0x138] sm:$0xff]   ;;  %v2464_v57 = vld [vmem:[%s2630_s21 + $0x160] sm:$0xff]   ;;  %v2465_v53 = vld [vmem:[%s2630_s21 + $0x168] sm:$0xff]   ;;  %v2529_v24 = vmov (!%p2209_p5), 0.0  }
 0x41c   : > { %1266 = vrot.lane.b32.xlu1 %v1264_v58, %s2527_s16  ;;  %1178 = vrot.lane.b32.xlu0 %v1176_v41, %s2527_s16  ;;  %v2463_v51 = vld [vmem:[%s2630_s21 + $0x158] sm:$0xff]  }
 0x41d   : > { %1221 = vst.msk [vmem:[#allocation5 + $0x8] sm:$0xff] %vm708_vm11, %v1220_v32  ;;  %1133 = vst.msk [vmem:[#allocation5] sm:$0xff] %vm708_vm11, %v1132_v38 }
 0x41e   : > { %2268 = vmatpush3.bf16.msra.mxu0 %v2448_v27 }
 0x41f   : > { %2269 = vmatprep.subr.bf16.mxu0 %v2449_v30  ;;  %v1873_v30 = vld [vmem:[%s3089_s5] sm:$0x1] (!%p2209_p5) }
 0x420   : > { %1292 = vrot.lane.b32.xlu1 %v1290_v43, %s2528_s17  ;;  %1204 = vrot.lane.b32.xlu0 %v1202_v45, %s2528_s17 }
 0x422   : > { %2270 = vmatpush3.bf16.msra.mxu0 %v2451_v31  ;;  %v2466_v31 = vld [vmem:[%s3093_s9] sm:$0xff] (!%p2209_p5)  }
 0x423   : > { %2271 = vmatprep.subr.bf16.mxu0 %v2452_v56  ;;  %v2467_v56 = vld [vmem:[%s3093_s9 + $0x8] sm:$0xff] (!%p2209_p5)  }
 0x424   : > { %1138 = vrot.lane.b32.xlu1 %v1136_v17, %s2528_s17  ;;  %1186 = vrot.lane.b32.xlu0 %v1184_v18, %s2526_s15  ;;  %v2453_v18 = vld [vmem:[%s2630_s21 + $0x110] sm:$0xff]  }
 0x426   : > { %2272 = vmatpush3.bf16.msra.mxu0 %v2454_v11  ;;  %v2468_v11 = vld [vmem:[%s3095_s11] sm:$0xff] (!%p2209_p5)  }
 0x427   : > { %2323 = vmatprep.subr.bf16.mxu0 (!%p2209_p5), %v2529_v24 }
 0x428   : > { %1212 = vrot.lane.b32.xlu1 %v1210_v19, %s2527_s16  ;;  %1226 = vrot.lane.b32.xlu0 %v1224_v20, %s2528_s17 }
 0x42c   : > { %1332 = vrot.lane.b32.xlu1 %v1330_v47, %s2526_s15  ;;  %1354 = vrot.lane.b32.xlu0 %v1352_v49, %s2527_s16 }
 0x430   : > { %1274 = vrot.lane.b32.xlu1 %v1272_v21, %s2526_s15  ;;  %1300 = vrot.lane.b32.xlu0 %v1298_v22, %s2527_s16  ;;  %v2455_v22 = vld [vmem:[%s2630_s21 + $0x118] sm:$0xff]  }
 0x434   : > { %1362 = vrot.lane.b32.xlu1 %v1360_v16, %s2526_s15  ;;  %1314 = vrot.lane.b32.xlu0 %v1312_v37, %s2528_s17 }
 0x48a   : > { %v1245_v1 = vpop.permute.xlu1 %1244  ;;  %v1157_v2 = vpop.permute.xlu0 %1156 }
 0x48b   : > { %1247 = vst.msk [vmem:[#allocation5 + $0x8] sm:$0xff] %vm767_vm12, %v1245_v1  ;;  %1159 = vst.msk [vmem:[#allocation5] sm:$0xff] %vm767_vm12, %v1157_v2 }
 0x48e   : > { %v1267_v3 = vpop.permute.xlu1 %1266  ;;  %v1179_v4 = vpop.permute.xlu0 %1178 }
 0x48f   : > { %1269 = vst.msk [vmem:[#allocation5 + $0x8] sm:$0xff] %vm826_vm13, %v1267_v3  ;;  %1181 = vst.msk [vmem:[#allocation5] sm:$0xff] %vm826_vm13, %v1179_v4 }
 0x492   : > { %v1293_v0 = vpop.permute.xlu1 %1292  ;;  %v1205_v5 = vpop.permute.xlu0 %1204 }
 0x493   : > { %1295 = vst.msk [vmem:[#allocation5 + $0x8] sm:$0xff] %vm885_vm14, %v1293_v0  ;;  %1207 = vst.msk [vmem:[#allocation5] sm:$0xff] %vm885_vm14, %v1205_v5  ;;  %v2469_v5 = vld [vmem:[%s3095_s11 + $0x8] sm:$0xff] (!%p2209_p5)  }
 0x496   : > { %v1139_v6 = vpop.permute.xlu1 %1138  ;;  %v1187_v7 = vpop.permute.xlu0 %1186 }
 0x497   : > { %1141 = vst.msk [vmem:[#allocation5 + $0x10] sm:$0xff] %vm885_vm14, %v1139_v6  ;;  %v2211_v6 = vld [vmem:[%s3094_s10] ss:$0 sm:$0xff] (!%p2209_p5) }
 0x498   : > { %1189 = vst.msk [vmem:[#allocation5 + $0x18] sm:$0xff] %vm767_vm12, %v1187_v7 }
 0x499   : > { %1309 = vst.msk [vmem:[#allocation5 + $0x10] sm:$0xff] %vm708_vm11, %v1308_v33 }
 0x49a   : > { %v1213_v10 = vpop.permute.xlu1 %1212  ;;  %v1227_v12 = vpop.permute.xlu0 %1226  ;;  %v1367_v13 = vld [vmem:[#allocation5 + $0x8] sm:$0xff]  ;;  %v1366_v14 = vld [vmem:[#allocation5] sm:$0xff] }
 0x49b   : > { %1215 = vst.msk [vmem:[#allocation5 + $0x18] sm:$0xff] %vm826_vm13, %v1213_v10  ;;  %1776 = vmatprep.mubr.bf16.mxu1 %v1367_v13 }
 0x49c   : > { %1229 = vst.msk [vmem:[#allocation5 + $0x18] sm:$0xff] %vm885_vm14, %v1227_v12  ;;  %1777 = vmatmul.mubr.bf16.vlgmr.msra.gmra.mrb[8].mxu1 %v1366_v14 }
 0x49d   : > { %1827 = vmatpush1.bf16.msra.mxu1 %v2447_v9 }
 0x49e   : > { %v1333_v16 = vpop.permute.xlu1 %1332  ;;  %v1355_v17 = vpop.permute.xlu0 %1354  ;;  %1828 = vmatprep.subr.bf16.mxu1 %v2525_v61 }
 0x49f   : > { %1335 = vst.msk [vmem:[#allocation5 + $0x10] sm:$0xff] %vm767_vm12, %v1333_v16  ;;  %v2215_v16 = vld [vmem:[%s3096_s12] ss:$0 sm:$0xff] (!%p2209_p5) }
 0x4a0   : > { %1357 = vst.msk [vmem:[#allocation5 + $0x10] sm:$0xff] %vm826_vm13, %v1355_v17 }
 0x4a1   : > { %1829 = vmatpush1.bf16.msra.mxu1 %v2450_v15 }
 0x4a2   : > { %v1275_v19 = vpop.permute.xlu1 %1274  ;;  %v1301_v20 = vpop.permute.xlu0 %1300  ;;  %1830 = vmatprep.subr.bf16.mxu1 %v2525_v61 }
 0x4a3   : > { %1277 = vst.msk [vmem:[#allocation5 + $0x20] sm:$0xff] %vm767_vm12, %v1275_v19  ;;  %v1369_v21 = vld [vmem:[#allocation5 + $0x18] sm:$0xff] }
 0x4a4   : > { %1303 = vst.msk [vmem:[#allocation5 + $0x20] sm:$0xff] %vm826_vm13, %v1301_v20  ;;  %1817 = vmatprep.mubr.bf16.mxu0 %v1369_v21 }
 0x4a5   : > { %1831 = vmatpush1.bf16.msra.mxu1 %v2453_v18 }
 0x4a6   : > { %v1363_v23 = vpop.permute.xlu1 %1362  ;;  %v1315_v25 = vpop.permute.xlu0 %1314  ;;  %1832 = vmatprep.subr.bf16.mxu1 %v2525_v61 }
 0x4a7   : > { %1365 = vst.msk [vmem:[#allocation5 + $0x28] sm:$0xff] %vm767_vm12, %v1363_v23  ;;  %v1368_v37 = vld [vmem:[#allocation5 + $0x10] sm:$0xff] }
 0x4a8   : > { %1317 = vst.msk [vmem:[#allocation5 + $0x20] sm:$0xff] %vm885_vm14, %v1315_v25  ;;  %1818 = vmatmul.mubr.bf16.vlgmr.msra.gmra.mrb[16].mxu0 %v1368_v37 }
 0x4a9   : > { %1833 = vmatpush1.bf16.msra.mxu1 %v2455_v22  ;;  %2325 = vmatprep.mubr.msk.bf16.mxu0 (!%p2209_p5), %vm2530_vm0, %v2529_v24 }
 0x4aa   : > { %1834 = vmatprep.subr.bf16.mxu1 %v2525_v61 }
 0x4ad   : > { %1835 = vmatpush1.bf16.msra.mxu1 %v2456_v40 }
 0x4ae   : > { %1836 = vmatprep.subr.bf16.mxu1 %v2525_v61  ;;  %v1371_v42 = vld [vmem:[#allocation5 + $0x28] sm:$0xff] }
 0x4af   : > { %2208 = vmatprep.mubr.msk.bf16.mxu1 %vm1740_vm15, %v1371_v42  ;;  %v1370_v54 = vld [vmem:[#allocation5 + $0x20] sm:$0xff] }
 0x4b1   : > { %1837 = vmatpush1.bf16.msra.mxu1 %v2457_v35 }
 0x4b2   : > { %1838 = vmatprep.subr.bf16.mxu1 %v2525_v61 }
 0x4b5   : > { %1839 = vmatpush1.bf16.msra.mxu1 %v2458_v44 }
 0x4b6   : > { %1840 = vmatprep.subr.bf16.mxu1 %v2525_v61 }
 0x4b9   : > { %1841 = vmatpush1.bf16.msra.mxu1 %v2459_v36 }
 0x4ba   : > { %1842 = vmatprep.subr.bf16.mxu1 %v2525_v61 }
 0x4bd   : > { %1843 = vmatpush1.bf16.msra.mxu1 %v2460_v46 }
 0x4be   : > { %1844 = vmatprep.subr.bf16.mxu1 %v2525_v61 }
 0x4c1   : > { %1845 = vmatpush1.bf16.msra.mxu1 %v2461_v48 }
 0x4c2   : > { %1846 = vmatprep.subr.bf16.mxu1 %v2525_v61 }
 0x4c5   : > { %1847 = vmatpush1.bf16.msra.mxu1 %v2462_v50 }
 0x4c6   : > { %1848 = vmatprep.subr.bf16.mxu1 %v2525_v61 }
 0x4c9   : > { %1849 = vmatpush1.bf16.msra.mxu1 %v2463_v51 }
 0x4ca   : > { %1850 = vmatprep.subr.bf16.mxu1 %v2525_v61 }
 0x4cd   : > { %1851 = vmatpush1.bf16.msra.mxu1 %v2464_v57 }
 0x4ce   : > { %1852 = vmatprep.subr.bf16.mxu1 %v2525_v61 }
 0x4d1   : > { %1853 = vmatpush1.bf16.msra.mxu1 %v2465_v53 }
 0x4d2   : > { %2329 = vmatprep.subr.bf16.mxu1 (!%p2209_p5), %v2529_v24 }
 0x4d4   : > { %1859 = vmatmul.mubr.bf16.vlgmr.msra.gmra.mrb[12].mxu1 %v1370_v54 }
 0x4d5   : > { %2333 = vmatprep.mubr.msk.bf16.mxu1 (!%p2209_p5), %vm2530_vm0, %v2529_v24  ;;  %2330 = vmatpush3.bf16.msra.mxu1 (!%p2209_p5), %v2466_v31 }
 0x4d6   : > { %2331 = vmatprep.subr.bf16.mxu1 (!%p2209_p5), %v2529_v24 }
 0x4d9   : > { %2332 = vmatpush3.bf16.msra.mxu1 (!%p2209_p5), %v2467_v56 }
 0x56f   : > { %v2251_v55 = vpop.f32.mrb[8].mxu1 }
 0x570   : > { %v2252_v39 = vpop.f32.mrb[9].mxu1 }
 0x571   : > { %v2253_v58 = vadd.f32 %v2252_v39, %v2251_v55  ;;  %v2254_v41 = vpop.f32.mrb[10].mxu1 }
 0x572   : > { %v2255_v43 = vpop.f32.mrb[11].mxu1 }
 0x573   : > { %v2256_v45 = vadd.f32 %v2255_v43, %v2254_v41 }
 0x57b   : > { %v2273_v47 = vpop.f32.mrb[16].mxu0 }
 0x57c   : > { %v2274_v49 = vpop.f32.mrb[17].mxu0 }
 0x57d   : > { %v2275_v52 = vadd.f32 %v2274_v49, %v2273_v47  ;;  %v2276_v62 = vpop.f32.mrb[18].mxu0 }
 0x57e   : > { %v2277_v59 = vpop.f32.mrb[19].mxu0 }
 0x57f   : > { %v2278_v60 = vadd.f32 %v2277_v59, %v2276_v62  ;;  %v1820_v63 = vadd.f32 %v2275_v52, %v2253_v58 }
 0x581   : > { %v1823_v8 = vadd.f32 %v2278_v60, %v2256_v45 }
 0x5a6   : > { %1872 = sbr.rel (%p2209_p5) target bundleno = 2112 (0x840), region = 80 }
 0x5a7   : > { %v1860_v26 = vpop.f32.mrb[12].mxu1 }
 0x5a8   : > { %v1861_v28 = vadd.f32 %v1860_v26, %v1820_v63  ;;  %v1862_v61 = vpop.f32.mrb[13].mxu1 }
 0x5a9   : > { %v1863_v29 = vpop.f32.mrb[14].mxu1 }
 0x5aa   : > { %1867 = vst.msk [vmem:[#allocation2] sm:$0xff] %vm708_vm11, %v1861_v28  ;;  %v1864_v34 = vadd.f32 %v1863_v29, %v1823_v8  ;;  %v1865_v33 = vpop.f32.mrb[15].mxu1 }
 0x5ac   : > { %1868 = vst.msk [vmem:[#allocation2 + $0x8] sm:$0xff] %vm708_vm11, %v1864_v34 }
 0x5b1   : > { %v1874_v32 = vld [vmem:[#allocation2] sm:$0xff] }
 0x5b3   : > { %v1875_v38 = vld [vmem:[#allocation2 + $0x8] sm:$0xff] }
 0x5b4   : > { %v1876_v27 = vpack.c.bf16 %v1875_v38, %v1874_v32 }
 0x5b6   : > { %2324 = vmatpush3.bf16.msra.mxu0 %v1876_v27 }
 0x5b7   : > { %2337 = vmatprep.subr.bf16.mxu0 %v2529_v24 }
 0x5b9   : > { %2326 = vmatmul.mubr.msk.bf16.vlgmr.msra.gmra.mrb[0].mxu0 %vm717_vm10, %v1873_v30 }
 0x5ba   : > { %2341 = vmatprep.mubr.msk.bf16.mxu0 %vm2530_vm0, %v2529_v24  ;;  %2338 = vmatpush3.bf16.msra.mxu0 %v2468_v11 }
 0x5bb   : > { %2339 = vmatprep.subr.bf16.mxu0 %v2529_v24 }
 0x5be   : > { %2340 = vmatpush3.bf16.msra.mxu0 %v2469_v5 }
 0x68c   : > { %v1914_v1 = vpop.f32.mrb[0].mxu0 }
 0x68d   : > { %v1920_v2 = vpack.c.bf16 %v1914_v1, %v1914_v1  ;;  %v2327_v3 = vpop.f32.mrb[1].mxu0 }
 0x68e   : > { %v1917_v4 = vpop.f32.mrb[2].mxu0 }
 0x68f   : > { %v2328_v0 = vpop.f32.mrb[3].mxu0  ;;  %2334 = vmatmul.mubr.msk.bf16.vlgmr.msra.gmra.mrb[0].mxu1 %vm708_vm11, %v1920_v2 }
 0x762   : > { %v1981_v7 = vpop.f32.mrb[0].mxu1 }
 0x763   : > { %v1982_v9 = vadd.f32 %v2211_v6, %v1981_v7  ;;  %v2335_v10 = vpop.f32.mrb[1].mxu1 }
 0x764   : > { %v1984_v12 = vpop.f32.mrb[2].mxu1 }
 0x765   : > { %v1987_v13 = vmax.f32 %v1982_v9, 0.0  ;;  %v2336_v14 = vpop.f32.mrb[3].mxu1 }
 0x767   : > { %v1988_v15 = vpack.c.bf16 %v1987_v13, %v1987_v13 }
 0x769   : > { %2342 = vmatmul.mubr.msk.bf16.vlgmr.msra.gmra.mrb[4].mxu0 %vm708_vm11, %v1988_v15 }
 0x83c   : > { %v2049_v17 = vpop.f32.mrb[4].mxu0 }
 0x83d   : > { %v2050_v18 = vadd.f32 %v2215_v16, %v2049_v17  ;;  %v2343_v19 = vpop.f32.mrb[5].mxu0 }
 0x83e   : > { %v2052_v20 = vpop.f32.mrb[6].mxu0 }
 0x83f   : > { %2056 = vst.msk [vmem:[#allocation6] sm:$0x3] %vm2055_vm1, %v2050_v18  ;;  %v2344_v21 = vpop.f32.mrb[7].mxu0 }
 0x840 PF: > { %p2351_p6 = scmp.eq.s32.totalorder %s2608_s26, 1  ;;  %s2531_s14 = smov [#allocation6]  }
 0x841   : > { %s2064_s21 = sshll.u32 %s2531_s14, 4  ;;  %s2065_s21 = int_to_ptr.vmem [resolvable:$true] %s2064_s21 }
 0x842   : > { %s2470_s20 = scalar_lea.vmem %s2065_s21, 32  ;;  %p2477_p10 = scmp.lt.s32.totalorder %s2065_s21, %s2065_s21 }
 0x843   : > { %p2471_p7 = scmp.ne.s32.totalorder %s2065_s21, %s2470_s20  ;;  %p2478_p11 = scmp.lt.s32.totalorder %s2470_s20, %s2470_s20 }
 0x845   : > { %p2472_p8 = pnand %p2471_p7, %p2351_p6  ;;  %p2479_p12 = por %p2478_p11, %p2477_p10 }
 0x847   : > { %p2473_p9 = pneg %p2472_p8 }
 0x849   : > { %p2480_p13 = pnand %p2479_p12, %p2473_p9 }
 0x84b   : > { %2483 = shalt.err (!%p2480_p13)
}
 0x84c   : > { %s2484_s24 = scalar_lea.hbm %s3097_s13, 32 }
 0x84d   : > { %p2485_p0 = scmp.ne.s32.totalorder %s3097_s13, %s2484_s24  ;;  %p2490_p3 = scmp.lt.u32.totalorder %s2484_s24, %s3097_s13 }
 0x84f   : > { %p2486_p1 = pnand %p2485_p0, %p2351_p6 }
 0x851   : > { %p2487_p2 = pneg %p2486_p1 }
 0x853   : > { %p2492_p4 = pnand %p2490_p3, %p2487_p2 }
 0x855   : > { %2495 = shalt.err (!%p2492_p4)
}
 0x856   : > { %2348 = dma.vmem_to_hbm [thread:$0]  (%p2351_p6), %s2065_s21, 32, %s3097_s13, [#allocation7]  }
 0x857   : > { %2501 = dma.done.wait (%p2351_p6), [#allocation7], 32  }
 0x858   : > { %2503 = vsyncadd (%p2351_p6), [#allocation7], 4294967264 }
 0x859 PF: > { %s24_s25 = sadd.s32 1, %s2506_s25  }
 0x85a   : > { %p21_p5 = scmp.ge.s32.totalorder %s24_s25, 4  }
 0x85c   :  { %23 = sbr.rel (!%p21_p5) target bundleno = 1 (0x1), region = 116 }
 0x863   :  { %2077 = vsyncpa [#allocation7], 1 }
 0x864   :  { %2079 = vsyncpa [#allocation7 + $0x1], 1 }

</bundles_post_ra>
